<compile_context>
chip_gen: v7x
topology: tpu7x:2x2x1
jax: 0.10.0
libtpu: 0.0.40
codegen_flags: <defaults>
</compile_context>

<pallas_src>
import functools

import jax
import jax.numpy as jnp
from jax.experimental import pallas as pl
from jax.experimental.pallas import tpu as pltpu


_NEG_BIG = -1e30  # sigmoid(-1e30) == 0  ->  update gate closed  ->  hidden state frozen


def stance_kernel(S_text,
                  emb_ref,        # (B, S_max, 2E) f32   [text | topic] embeddings, zero-padded
                  w_in_ref,       # (2E, 4H)       bf16  block-diag input proj (o-cols pre-scaled x2)
                  b_all_ref,      # (S_max, 4H)    f32   gate bias + per-step padding mask
                  w_rec_ref,      # (2H, 4H)       bf16  block-diag recurrent weight (o-cols x2)
                  wa_ref,         # (1, H)         f32   attention Linear(H -> 1) weight
                  w1c_ref,        # (H, H)         f32   fc1 rows acting on attention context
                  w1t_ref,        # (H, H)         f32   fc1 rows acting on topic hidden
                  b1_ref,         # (1, H)         f32
                  w2_ref,         # (H, C)         f32
                  b2_ref,         # (1, C)         f32
                  logits_ref,     # (B, C)         out
                  attnw_ref):     # (B, S_text)    out
    B, S_max, twoE = emb_ref.shape
    H = w_rec_ref.shape[0] // 2
    G = 4 * H

    # ---- hoisted input projection for BOTH streams: one MXU visit, bias+mask folded in ----
    emb = emb_ref[...].astype(jnp.bfloat16).reshape(B * S_max, twoE)
    proj = jnp.dot(emb, w_in_ref[...], preferred_element_type=jnp.float32)
    x_all = proj.reshape(B, S_max, G) + b_all_ref[...]            # (B, S_max, 4H)

    w_rec = w_rec_ref[...]                                        # loop-invariant (2H, 4H) bf16

    # fused state h = [h_text | h_topic]; gate vreg = [z_text | z_topic | o_text | o_topic]
    h = jnp.zeros((B, 2 * H), jnp.float32)
    text_outs = []
    for t in range(S_max):                                        # static unroll (tiny seq lens)
        g = jnp.dot(h.astype(jnp.bfloat16), w_rec,
                    preferred_element_type=jnp.float32) + x_all[:, t, :]   # (B, 4H=128)
        s = jax.nn.sigmoid(g)                 # single EUP pass over one full 128-lane vreg
        z = s[:, :2 * H]                      # [z_text | z_topic]
        o = 2.0 * s[:, 2 * H:] - 1.0          # tanh(x) = 2*sigmoid(2x) - 1 (weights pre-scaled)
        h = (1.0 - z) * h + z * o             # padded steps: z == 0 -> state unchanged
        if t < S_text:
            text_outs.append(h[:, :H])        # keep text hidden states in vregs

    h_topic = h[:, H:]                        # final topic hidden state (B, H)

    # ---- BasicAttention over text hidden states (score bias dropped: softmax shift-invariant) ----
    text_out = jnp.stack(text_outs, axis=1)                       # (B, S, H), vreg-resident
    wa = wa_ref[...].reshape(1, 1, H)
    scores = jnp.sum(text_out * wa, axis=-1)                      # (B, S)
    m = jnp.max(scores, axis=-1, keepdims=True)
    e = jnp.exp(scores - m)
    attn = e / jnp.sum(e, axis=-1, keepdims=True)
    attnw_ref[...] = attn
    context = jnp.sum(attn[:, :, None] * text_out, axis=1)        # (B, H)

    # ---- classifier head (dropout == identity in eval mode); fc1 without lane concat ----
    pre1 = (jnp.dot(context, w1c_ref[...], preferred_element_type=jnp.float32)
            + jnp.dot(h_topic, w1t_ref[...], preferred_element_type=jnp.float32)
            + b1_ref[...])
    x1 = jnp.maximum(pre1, 0.0)
    logits_ref[...] = (jnp.dot(x1, w2_ref[...], preferred_element_type=jnp.float32)
                       + b2_ref[...])


def _pack_weights(params, E, H):
    """Pack both MinGRUCells into one block-diagonal [z_t | z_p | o_t | o_p] gate matmul.

    The o-gate columns and biases are pre-scaled by 2 so a single sigmoid over the whole
    4H-lane gate vector yields tanh via tanh(x) = 2*sigmoid(2x) - 1.
    """
    def split(w):
        return w[:E], w[E:]
    wz_t_in, wz_t_rec = split(params["wz_t"])
    wo_t_in, wo_t_rec = split(params["wo_t"])
    wz_p_in, wz_p_rec = split(params["wz_p"])
    wo_p_in, wo_p_rec = split(params["wo_p"])

    Ze = jnp.zeros((E, H), jnp.float32)
    Zh = jnp.zeros((H, H), jnp.float32)
    w_in = jnp.concatenate([
        jnp.concatenate([wz_t_in, Ze, 2.0 * wo_t_in, Ze], axis=1),
        jnp.concatenate([Ze, wz_p_in, Ze, 2.0 * wo_p_in], axis=1)], axis=0)      # (2E, 4H)
    w_rec = jnp.concatenate([
        jnp.concatenate([wz_t_rec, Zh, 2.0 * wo_t_rec, Zh], axis=1),
        jnp.concatenate([Zh, wz_p_rec, Zh, 2.0 * wo_p_rec], axis=1)], axis=0)    # (2H, 4H)
    b_row = jnp.concatenate([params["bz_t"], params["bz_p"],
                             2.0 * params["bo_t"], 2.0 * params["bo_p"]], axis=1)  # (1, 4H)
    return w_in.astype(jnp.bfloat16), w_rec.astype(jnp.bfloat16), b_row


def stance_forward(text, topic, params):
    B, S = text.shape
    St = topic.shape[1]
    E = params["word_emb"].shape[1]
    H = params["wz_t"].shape[1]
    C = params["w2"].shape[1]
    max_seq = params["pos_emb"].shape[0]
    S_max = max(S, St)

    # ---- glue: embedding gathers + positional embeddings (plain JAX) ----
    pos_t = jnp.clip(jnp.arange(S), 0, max_seq - 1)
    pos_p = jnp.clip(jnp.arange(St), 0, max_seq - 1)
    text_emb = (params["word_emb"][text] + params["pos_emb"][pos_t][None]).astype(jnp.float32)
    topic_emb = (params["word_emb"][topic] + params["pos_emb"][pos_p][None]).astype(jnp.float32)
    # both streams side-by-side on the feature axis, zero-padded to the common length
    emb_all = jnp.concatenate(
        [jnp.pad(text_emb, ((0, 0), (0, S_max - S), (0, 0))),
         jnp.pad(topic_emb, ((0, 0), (0, S_max - St), (0, 0)))], axis=-1)        # (B, S_max, 2E)

    # ---- weight packing (once, outside the kernel) ----
    w_in, w_rec, b_row = _pack_weights(params, E, H)
    steps = jnp.arange(S_max)[:, None]
    mask = jnp.concatenate(                                                     # -inf-ish on z lanes
        [jnp.broadcast_to(jnp.where(steps < S, 0.0, _NEG_BIG), (S_max, H)),     #   of padded steps
         jnp.broadcast_to(jnp.where(steps < St, 0.0, _NEG_BIG), (S_max, H)),
         jnp.zeros((S_max, 2 * H), jnp.float32)], axis=1).astype(jnp.float32)
    b_all = (b_row + mask).astype(jnp.float32)                                  # (S_max, 4H)

    w1c = params["w1"][:H]      # fc1 rows acting on the attention context
    w1t = params["w1"][H:]      # fc1 rows acting on the topic hidden state

    kernel = functools.partial(stance_kernel, S)
    inputs = (emb_all, w_in, b_all, w_rec,
              params["wa"], w1c, w1t, params["b1"], params["w2"], params["b2"])

    vmem = pl.BlockSpec(memory_space=pltpu.MemorySpace.VMEM)
    logits, attn = pl.pallas_call(
        kernel,
        out_shape=(jax.ShapeDtypeStruct((B, C), jnp.float32),
                   jax.ShapeDtypeStruct((B, S), jnp.float32)),
        in_specs=[vmem] * len(inputs),
        out_specs=(vmem, vmem),
    )(*inputs)
    return logits, attn


# ------------------------- pure-JAX reference (PyTorch semantics) -------------------------

def _mingru_ref(emb, wz, bz, wo, bo, H):
    B, S, _ = emb.shape
    h = jnp.zeros((B, H), jnp.float32)
    outs = []
    for t in range(S):
        comb = jnp.concatenate([emb[:, t, :], h], axis=1)
        z = jax.nn.sigmoid(comb @ wz + bz)
        h_tilde = jnp.tanh(comb @ wo + bo)
        h = (1.0 - z) * h + z * h_tilde
        outs.append(h)
    return jnp.stack(outs, axis=1), h


def stance_reference(text, topic, params):
    B, S = text.shape
    St = topic.shape[1]
    H = params["wz_t"].shape[1]
    max_seq = params["pos_emb"].shape[0]
    pos_t = jnp.clip(jnp.arange(S), 0, max_seq - 1)
    pos_p = jnp.clip(jnp.arange(St), 0, max_seq - 1)
    text_emb = params["word_emb"][text] + params["pos_emb"][pos_t][None]
    topic_emb = params["word_emb"][topic] + params["pos_emb"][pos_p][None]
    text_out, _ = _mingru_ref(text_emb, params["wz_t"], params["bz_t"],
                              params["wo_t"], params["bo_t"], H)
    _, topic_hidden = _mingru_ref(topic_emb, params["wz_p"], params["bz_p"],
                                  params["wo_p"], params["bo_p"], H)
    scores = jnp.squeeze(text_out @ params["wa"].T, -1) + params["ba"][0, 0]
    attn = jax.nn.softmax(scores, axis=1)
    context = jnp.einsum('bs,bsh->bh', attn, text_out)
    combined = jnp.concatenate([context, topic_hidden], axis=1)
    x = jax.nn.relu(combined @ params["w1"] + params["b1"])
    logits = x @ params["w2"] + params["b2"]
    return logits, attn


def init_params(key, vocab_size, E, H, C, max_seq_len):
    ks = jax.random.split(key, 11)

    def xavier(k, shape):
        lim = (6.0 / (shape[0] + shape[1])) ** 0.5
        return jax.random.uniform(k, shape, jnp.float32, -lim, lim)

    word_emb = jax.random.normal(ks[0], (vocab_size, E), jnp.float32) * 0.1
    word_emb = word_emb.at[0].set(0.0)   # padding_idx=0 -> zero row
    pos_emb = jax.random.normal(ks[1], (max_seq_len, E), jnp.float32) * 0.1

    return dict(
        word_emb=word_emb, pos_emb=pos_emb,
        # MinGRU gates: Linear(E+H -> H), stored pre-transposed (in, out), zero bias
        wz_t=xavier(ks[2], (E + H, H)), bz_t=jnp.zeros((1, H), jnp.float32),
        wo_t=xavier(ks[3], (E + H, H)), bo_t=jnp.zeros((1, H), jnp.float32),
        wz_p=xavier(ks[4], (E + H, H)), bz_p=jnp.zeros((1, H), jnp.float32),
        wo_p=xavier(ks[5], (E + H, H)), bo_p=jnp.zeros((1, H), jnp.float32),
        # attention Linear(H -> 1): weight stored as (1, H)
        wa=xavier(ks[6], (1, H)), ba=jnp.zeros((1, 1), jnp.float32),
        # classifier head
        w1=xavier(ks[7], (2 * H, H)), b1=jax.random.normal(ks[8], (1, H), jnp.float32) * 0.01,
        w2=xavier(ks[9], (H, C)),     b2=jax.random.normal(ks[10], (1, C), jnp.float32) * 0.01,
    )


if __name__ == "__main__":
    key = jax.random.PRNGKey(0)
    vocab_size, E, H, C, max_seq_len = 50, 32, 32, 3, 16
    B, S, St = 2, 8, 5

    kp, kt, kq = jax.random.split(key, 3)
    params = init_params(kp, vocab_size, E, H, C, max_seq_len)
    text = jax.random.randint(kt, (B, S), 0, vocab_size, dtype=jnp.int32)
    topic = jax.random.randint(kq, (B, St), 0, vocab_size, dtype=jnp.int32)

    logits, attn = stance_forward(text, topic, params)
    jax.block_until_ready((logits, attn))

    assert logits.shape == (B, C) and attn.shape == (B, S)
    assert bool(jnp.all(jnp.isfinite(logits)))
    # attention weights must sum to 1 over the sequence axis
    assert bool(jnp.allclose(jnp.sum(attn, axis=1), 1.0, atol=1e-5))

    # compare against a pure-JAX f32 reference (loose tolerance: bf16 MXU operands)
    ref_logits, ref_attn = stance_reference(text, topic, params)
    assert bool(jnp.allclose(logits, ref_logits, atol=5e-2, rtol=5e-2))
    assert bool(jnp.allclose(attn, ref_attn, atol=2e-2))

    print("KERNEL_OK")
</pallas_src>

<mosaic_0001>
module attributes {stable_mosaic.version = 11 : i64} {
  func.func @stance_kernel(%arg0: memref<2x8x64xf32, #tpu.memory_space<vmem>>, %arg1: memref<64x128xbf16, #tpu.memory_space<vmem>>, %arg2: memref<8x128xf32, #tpu.memory_space<vmem>>, %arg3: memref<64x128xbf16, #tpu.memory_space<vmem>>, %arg4: memref<1x32xf32, #tpu.memory_space<vmem>>, %arg5: memref<32x32xf32, #tpu.memory_space<vmem>>, %arg6: memref<32x32xf32, #tpu.memory_space<vmem>>, %arg7: memref<1x32xf32, #tpu.memory_space<vmem>>, %arg8: memref<32x3xf32, #tpu.memory_space<vmem>>, %arg9: memref<1x3xf32, #tpu.memory_space<vmem>>, %arg10: memref<2x3xf32, #tpu.memory_space<vmem>>, %arg11: memref<2x8xf32, #tpu.memory_space<vmem>>) attributes {dimension_semantics = [], scalar_prefetch = 0 : i64, scratch_operands = 0 : i64, tpu.core_type = #tpu.core_type<tc>} {
    %c0 = arith.constant 0 : index
    %c0_0 = arith.constant 0 : index
    %c0_1 = arith.constant 0 : index
    %0 = vector.load %arg0[%c0, %c0_0, %c0_1] : memref<2x8x64xf32, #tpu.memory_space<vmem>>, vector<2x8x64xf32>
    %1 = arith.truncf %0 : vector<2x8x64xf32> to vector<2x8x64xbf16>
    %2 = vector.shape_cast %1 : vector<2x8x64xbf16> to vector<16x64xbf16>
    %c0_2 = arith.constant 0 : index
    %c0_3 = arith.constant 0 : index
    %3 = vector.load %arg1[%c0_2, %c0_3] : memref<64x128xbf16, #tpu.memory_space<vmem>>, vector<64x128xbf16>
    %cst = arith.constant dense<0.000000e+00> : vector<16x128xf32>
    %4 = tpu.matmul %2, %3, %cst {dimension_numbers = #tpu.dot_dimension_numbers<[1], [0], [0], [1], [0, 0, 1, 1], [], []>} : vector<16x64xbf16>, vector<64x128xbf16>, vector<16x128xf32> -> vector<16x128xf32>
    %5 = vector.shape_cast %4 : vector<16x128xf32> to vector<2x8x128xf32>
    %c0_4 = arith.constant 0 : index
    %c0_5 = arith.constant 0 : index
    %6 = vector.load %arg2[%c0_4, %c0_5] : memref<8x128xf32, #tpu.memory_space<vmem>>, vector<8x128xf32>
    %7 = vector.shape_cast %6 : vector<8x128xf32> to vector<1x8x128xf32>
    %8 = vector.broadcast %7 : vector<1x8x128xf32> to vector<2x8x128xf32>
    %9 = arith.addf %5, %8 : vector<2x8x128xf32>
    %c0_6 = arith.constant 0 : index
    %c0_7 = arith.constant 0 : index
    %10 = vector.load %arg3[%c0_6, %c0_7] : memref<64x128xbf16, #tpu.memory_space<vmem>>, vector<64x128xbf16>
    %cst_8 = arith.constant 0.000000e+00 : f32
    %11 = vector.broadcast %cst_8 : f32 to vector<2x64xf32>
    %12 = arith.truncf %11 : vector<2x64xf32> to vector<2x64xbf16>
    %cst_9 = arith.constant dense<0.000000e+00> : vector<2x128xf32>
    %13 = tpu.matmul %12, %10, %cst_9 {dimension_numbers = #tpu.dot_dimension_numbers<[1], [0], [0], [1], [0, 0, 1, 1], [], []>} : vector<2x64xbf16>, vector<64x128xbf16>, vector<2x128xf32> -> vector<2x128xf32>
    %14 = vector.extract_strided_slice %9 {offsets = [0, 0, 0], sizes = [2, 1, 128], strides = [1, 1, 1]} : vector<2x8x128xf32> to vector<2x1x128xf32>
    %15 = vector.shape_cast %14 : vector<2x1x128xf32> to vector<2x128xf32>
    %16 = arith.addf %13, %15 : vector<2x128xf32>
    %17 = arith.negf %16 : vector<2x128xf32>
    %18 = math.exp %17 : vector<2x128xf32>
    %cst_10 = arith.constant 1.000000e+00 : f32
    %19 = vector.broadcast %cst_10 : f32 to vector<2x128xf32>
    %20 = arith.addf %19, %18 : vector<2x128xf32>
    %21 = arith.divf %19, %20 : vector<2x128xf32>
    %22 = vector.extract_strided_slice %21 {offsets = [0, 0], sizes = [2, 64], strides = [1, 1]} : vector<2x128xf32> to vector<2x64xf32>
    %23 = vector.extract_strided_slice %21 {offsets = [0, 64], sizes = [2, 64], strides = [1, 1]} : vector<2x128xf32> to vector<2x64xf32>
    %cst_11 = arith.constant 2.000000e+00 : f32
    %24 = vector.broadcast %cst_11 : f32 to vector<2x64xf32>
    %25 = arith.mulf %24, %23 : vector<2x64xf32>
    %cst_12 = arith.constant 1.000000e+00 : f32
    %26 = vector.broadcast %cst_12 : f32 to vector<2x64xf32>
    %27 = arith.subf %25, %26 : vector<2x64xf32>
    %cst_13 = arith.constant 1.000000e+00 : f32
    %28 = vector.broadcast %cst_13 : f32 to vector<2x64xf32>
    %29 = arith.subf %28, %22 : vector<2x64xf32>
    %30 = arith.mulf %29, %11 : vector<2x64xf32>
    %31 = arith.mulf %22, %27 : vector<2x64xf32>
    %32 = arith.addf %30, %31 : vector<2x64xf32>
    %33 = vector.extract_strided_slice %32 {offsets = [0, 0], sizes = [2, 32], strides = [1, 1]} : vector<2x64xf32> to vector<2x32xf32>
    %34 = arith.truncf %32 : vector<2x64xf32> to vector<2x64xbf16>
    %cst_14 = arith.constant dense<0.000000e+00> : vector<2x128xf32>
    %35 = tpu.matmul %34, %10, %cst_14 {dimension_numbers = #tpu.dot_dimension_numbers<[1], [0], [0], [1], [0, 0, 1, 1], [], []>} : vector<2x64xbf16>, vector<64x128xbf16>, vector<2x128xf32> -> vector<2x128xf32>
    %36 = vector.extract_strided_slice %9 {offsets = [0, 1, 0], sizes = [2, 1, 128], strides = [1, 1, 1]} : vector<2x8x128xf32> to vector<2x1x128xf32>
    %37 = vector.shape_cast %36 : vector<2x1x128xf32> to vector<2x128xf32>
    %38 = arith.addf %35, %37 : vector<2x128xf32>
    %39 = arith.negf %38 : vector<2x128xf32>
    %40 = math.exp %39 : vector<2x128xf32>
    %cst_15 = arith.constant 1.000000e+00 : f32
    %41 = vector.broadcast %cst_15 : f32 to vector<2x128xf32>
    %42 = arith.addf %41, %40 : vector<2x128xf32>
    %43 = arith.divf %41, %42 : vector<2x128xf32>
    %44 = vector.extract_strided_slice %43 {offsets = [0, 0], sizes = [2, 64], strides = [1, 1]} : vector<2x128xf32> to vector<2x64xf32>
    %45 = vector.extract_strided_slice %43 {offsets = [0, 64], sizes = [2, 64], strides = [1, 1]} : vector<2x128xf32> to vector<2x64xf32>
    %cst_16 = arith.constant 2.000000e+00 : f32
    %46 = vector.broadcast %cst_16 : f32 to vector<2x64xf32>
    %47 = arith.mulf %46, %45 : vector<2x64xf32>
    %cst_17 = arith.constant 1.000000e+00 : f32
    %48 = vector.broadcast %cst_17 : f32 to vector<2x64xf32>
    %49 = arith.subf %47, %48 : vector<2x64xf32>
    %cst_18 = arith.constant 1.000000e+00 : f32
    %50 = vector.broadcast %cst_18 : f32 to vector<2x64xf32>
    %51 = arith.subf %50, %44 : vector<2x64xf32>
    %52 = arith.mulf %51, %32 : vector<2x64xf32>
    %53 = arith.mulf %44, %49 : vector<2x64xf32>
    %54 = arith.addf %52, %53 : vector<2x64xf32>
    %55 = vector.extract_strided_slice %54 {offsets = [0, 0], sizes = [2, 32], strides = [1, 1]} : vector<2x64xf32> to vector<2x32xf32>
    %56 = arith.truncf %54 : vector<2x64xf32> to vector<2x64xbf16>
    %cst_19 = arith.constant dense<0.000000e+00> : vector<2x128xf32>
    %57 = tpu.matmul %56, %10, %cst_19 {dimension_numbers = #tpu.dot_dimension_numbers<[1], [0], [0], [1], [0, 0, 1, 1], [], []>} : vector<2x64xbf16>, vector<64x128xbf16>, vector<2x128xf32> -> vector<2x128xf32>
    %58 = vector.extract_strided_slice %9 {offsets = [0, 2, 0], sizes = [2, 1, 128], strides = [1, 1, 1]} : vector<2x8x128xf32> to vector<2x1x128xf32>
    %59 = vector.shape_cast %58 : vector<2x1x128xf32> to vector<2x128xf32>
    %60 = arith.addf %57, %59 : vector<2x128xf32>
    %61 = arith.negf %60 : vector<2x128xf32>
    %62 = math.exp %61 : vector<2x128xf32>
    %cst_20 = arith.constant 1.000000e+00 : f32
    %63 = vector.broadcast %cst_20 : f32 to vector<2x128xf32>
    %64 = arith.addf %63, %62 : vector<2x128xf32>
    %65 = arith.divf %63, %64 : vector<2x128xf32>
    %66 = vector.extract_strided_slice %65 {offsets = [0, 0], sizes = [2, 64], strides = [1, 1]} : vector<2x128xf32> to vector<2x64xf32>
    %67 = vector.extract_strided_slice %65 {offsets = [0, 64], sizes = [2, 64], strides = [1, 1]} : vector<2x128xf32> to vector<2x64xf32>
    %cst_21 = arith.constant 2.000000e+00 : f32
    %68 = vector.broadcast %cst_21 : f32 to vector<2x64xf32>
    %69 = arith.mulf %68, %67 : vector<2x64xf32>
    %cst_22 = arith.constant 1.000000e+00 : f32
    %70 = vector.broadcast %cst_22 : f32 to vector<2x64xf32>
    %71 = arith.subf %69, %70 : vector<2x64xf32>
    %cst_23 = arith.constant 1.000000e+00 : f32
    %72 = vector.broadcast %cst_23 : f32 to vector<2x64xf32>
    %73 = arith.subf %72, %66 : vector<2x64xf32>
    %74 = arith.mulf %73, %54 : vector<2x64xf32>
    %75 = arith.mulf %66, %71 : vector<2x64xf32>
    %76 = arith.addf %74, %75 : vector<2x64xf32>
    %77 = vector.extract_strided_slice %76 {offsets = [0, 0], sizes = [2, 32], strides = [1, 1]} : vector<2x64xf32> to vector<2x32xf32>
    %78 = arith.truncf %76 : vector<2x64xf32> to vector<2x64xbf16>
    %cst_24 = arith.constant dense<0.000000e+00> : vector<2x128xf32>
    %79 = tpu.matmul %78, %10, %cst_24 {dimension_numbers = #tpu.dot_dimension_numbers<[1], [0], [0], [1], [0, 0, 1, 1], [], []>} : vector<2x64xbf16>, vector<64x128xbf16>, vector<2x128xf32> -> vector<2x128xf32>
    %80 = vector.extract_strided_slice %9 {offsets = [0, 3, 0], sizes = [2, 1, 128], strides = [1, 1, 1]} : vector<2x8x128xf32> to vector<2x1x128xf32>
    %81 = vector.shape_cast %80 : vector<2x1x128xf32> to vector<2x128xf32>
    %82 = arith.addf %79, %81 : vector<2x128xf32>
    %83 = arith.negf %82 : vector<2x128xf32>
    %84 = math.exp %83 : vector<2x128xf32>
    %cst_25 = arith.constant 1.000000e+00 : f32
    %85 = vector.broadcast %cst_25 : f32 to vector<2x128xf32>
    %86 = arith.addf %85, %84 : vector<2x128xf32>
    %87 = arith.divf %85, %86 : vector<2x128xf32>
    %88 = vector.extract_strided_slice %87 {offsets = [0, 0], sizes = [2, 64], strides = [1, 1]} : vector<2x128xf32> to vector<2x64xf32>
    %89 = vector.extract_strided_slice %87 {offsets = [0, 64], sizes = [2, 64], strides = [1, 1]} : vector<2x128xf32> to vector<2x64xf32>
    %cst_26 = arith.constant 2.000000e+00 : f32
    %90 = vector.broadcast %cst_26 : f32 to vector<2x64xf32>
    %91 = arith.mulf %90, %89 : vector<2x64xf32>
    %cst_27 = arith.constant 1.000000e+00 : f32
    %92 = vector.broadcast %cst_27 : f32 to vector<2x64xf32>
    %93 = arith.subf %91, %92 : vector<2x64xf32>
    %cst_28 = arith.constant 1.000000e+00 : f32
    %94 = vector.broadcast %cst_28 : f32 to vector<2x64xf32>
    %95 = arith.subf %94, %88 : vector<2x64xf32>
    %96 = arith.mulf %95, %76 : vector<2x64xf32>
    %97 = arith.mulf %88, %93 : vector<2x64xf32>
    %98 = arith.addf %96, %97 : vector<2x64xf32>
    %99 = vector.extract_strided_slice %98 {offsets = [0, 0], sizes = [2, 32], strides = [1, 1]} : vector<2x64xf32> to vector<2x32xf32>
    %100 = arith.truncf %98 : vector<2x64xf32> to vector<2x64xbf16>
    %cst_29 = arith.constant dense<0.000000e+00> : vector<2x128xf32>
    %101 = tpu.matmul %100, %10, %cst_29 {dimension_numbers = #tpu.dot_dimension_numbers<[1], [0], [0], [1], [0, 0, 1, 1], [], []>} : vector<2x64xbf16>, vector<64x128xbf16>, vector<2x128xf32> -> vector<2x128xf32>
    %102 = vector.extract_strided_slice %9 {offsets = [0, 4, 0], sizes = [2, 1, 128], strides = [1, 1, 1]} : vector<2x8x128xf32> to vector<2x1x128xf32>
    %103 = vector.shape_cast %102 : vector<2x1x128xf32> to vector<2x128xf32>
    %104 = arith.addf %101, %103 : vector<2x128xf32>
    %105 = arith.negf %104 : vector<2x128xf32>
    %106 = math.exp %105 : vector<2x128xf32>
    %cst_30 = arith.constant 1.000000e+00 : f32
    %107 = vector.broadcast %cst_30 : f32 to vector<2x128xf32>
    %108 = arith.addf %107, %106 : vector<2x128xf32>
    %109 = arith.divf %107, %108 : vector<2x128xf32>
    %110 = vector.extract_strided_slice %109 {offsets = [0, 0], sizes = [2, 64], strides = [1, 1]} : vector<2x128xf32> to vector<2x64xf32>
    %111 = vector.extract_strided_slice %109 {offsets = [0, 64], sizes = [2, 64], strides = [1, 1]} : vector<2x128xf32> to vector<2x64xf32>
    %cst_31 = arith.constant 2.000000e+00 : f32
    %112 = vector.broadcast %cst_31 : f32 to vector<2x64xf32>
    %113 = arith.mulf %112, %111 : vector<2x64xf32>
    %cst_32 = arith.constant 1.000000e+00 : f32
    %114 = vector.broadcast %cst_32 : f32 to vector<2x64xf32>
    %115 = arith.subf %113, %114 : vector<2x64xf32>
    %cst_33 = arith.constant 1.000000e+00 : f32
    %116 = vector.broadcast %cst_33 : f32 to vector<2x64xf32>
    %117 = arith.subf %116, %110 : vector<2x64xf32>
    %118 = arith.mulf %117, %98 : vector<2x64xf32>
    %119 = arith.mulf %110, %115 : vector<2x64xf32>
    %120 = arith.addf %118, %119 : vector<2x64xf32>
    %121 = vector.extract_strided_slice %120 {offsets = [0, 0], sizes = [2, 32], strides = [1, 1]} : vector<2x64xf32> to vector<2x32xf32>
    %122 = arith.truncf %120 : vector<2x64xf32> to vector<2x64xbf16>
    %cst_34 = arith.constant dense<0.000000e+00> : vector<2x128xf32>
    %123 = tpu.matmul %122, %10, %cst_34 {dimension_numbers = #tpu.dot_dimension_numbers<[1], [0], [0], [1], [0, 0, 1, 1], [], []>} : vector<2x64xbf16>, vector<64x128xbf16>, vector<2x128xf32> -> vector<2x128xf32>
    %124 = vector.extract_strided_slice %9 {offsets = [0, 5, 0], sizes = [2, 1, 128], strides = [1, 1, 1]} : vector<2x8x128xf32> to vector<2x1x128xf32>
    %125 = vector.shape_cast %124 : vector<2x1x128xf32> to vector<2x128xf32>
    %126 = arith.addf %123, %125 : vector<2x128xf32>
    %127 = arith.negf %126 : vector<2x128xf32>
    %128 = math.exp %127 : vector<2x128xf32>
    %cst_35 = arith.constant 1.000000e+00 : f32
    %129 = vector.broadcast %cst_35 : f32 to vector<2x128xf32>
    %130 = arith.addf %129, %128 : vector<2x128xf32>
    %131 = arith.divf %129, %130 : vector<2x128xf32>
    %132 = vector.extract_strided_slice %131 {offsets = [0, 0], sizes = [2, 64], strides = [1, 1]} : vector<2x128xf32> to vector<2x64xf32>
    %133 = vector.extract_strided_slice %131 {offsets = [0, 64], sizes = [2, 64], strides = [1, 1]} : vector<2x128xf32> to vector<2x64xf32>
    %cst_36 = arith.constant 2.000000e+00 : f32
    %134 = vector.broadcast %cst_36 : f32 to vector<2x64xf32>
    %135 = arith.mulf %134, %133 : vector<2x64xf32>
    %cst_37 = arith.constant 1.000000e+00 : f32
    %136 = vector.broadcast %cst_37 : f32 to vector<2x64xf32>
    %137 = arith.subf %135, %136 : vector<2x64xf32>
    %cst_38 = arith.constant 1.000000e+00 : f32
    %138 = vector.broadcast %cst_38 : f32 to vector<2x64xf32>
    %139 = arith.subf %138, %132 : vector<2x64xf32>
    %140 = arith.mulf %139, %120 : vector<2x64xf32>
    %141 = arith.mulf %132, %137 : vector<2x64xf32>
    %142 = arith.addf %140, %141 : vector<2x64xf32>
    %143 = vector.extract_strided_slice %142 {offsets = [0, 0], sizes = [2, 32], strides = [1, 1]} : vector<2x64xf32> to vector<2x32xf32>
    %144 = arith.truncf %142 : vector<2x64xf32> to vector<2x64xbf16>
    %cst_39 = arith.constant dense<0.000000e+00> : vector<2x128xf32>
    %145 = tpu.matmul %144, %10, %cst_39 {dimension_numbers = #tpu.dot_dimension_numbers<[1], [0], [0], [1], [0, 0, 1, 1], [], []>} : vector<2x64xbf16>, vector<64x128xbf16>, vector<2x128xf32> -> vector<2x128xf32>
    %146 = vector.extract_strided_slice %9 {offsets = [0, 6, 0], sizes = [2, 1, 128], strides = [1, 1, 1]} : vector<2x8x128xf32> to vector<2x1x128xf32>
    %147 = vector.shape_cast %146 : vector<2x1x128xf32> to vector<2x128xf32>
    %148 = arith.addf %145, %147 : vector<2x128xf32>
    %149 = arith.negf %148 : vector<2x128xf32>
    %150 = math.exp %149 : vector<2x128xf32>
    %cst_40 = arith.constant 1.000000e+00 : f32
    %151 = vector.broadcast %cst_40 : f32 to vector<2x128xf32>
    %152 = arith.addf %151, %150 : vector<2x128xf32>
    %153 = arith.divf %151, %152 : vector<2x128xf32>
    %154 = vector.extract_strided_slice %153 {offsets = [0, 0], sizes = [2, 64], strides = [1, 1]} : vector<2x128xf32> to vector<2x64xf32>
    %155 = vector.extract_strided_slice %153 {offsets = [0, 64], sizes = [2, 64], strides = [1, 1]} : vector<2x128xf32> to vector<2x64xf32>
    %cst_41 = arith.constant 2.000000e+00 : f32
    %156 = vector.broadcast %cst_41 : f32 to vector<2x64xf32>
    %157 = arith.mulf %156, %155 : vector<2x64xf32>
    %cst_42 = arith.constant 1.000000e+00 : f32
    %158 = vector.broadcast %cst_42 : f32 to vector<2x64xf32>
    %159 = arith.subf %157, %158 : vector<2x64xf32>
    %cst_43 = arith.constant 1.000000e+00 : f32
    %160 = vector.broadcast %cst_43 : f32 to vector<2x64xf32>
    %161 = arith.subf %160, %154 : vector<2x64xf32>
    %162 = arith.mulf %161, %142 : vector<2x64xf32>
    %163 = arith.mulf %154, %159 : vector<2x64xf32>
    %164 = arith.addf %162, %163 : vector<2x64xf32>
    %165 = vector.extract_strided_slice %164 {offsets = [0, 0], sizes = [2, 32], strides = [1, 1]} : vector<2x64xf32> to vector<2x32xf32>
    %166 = arith.truncf %164 : vector<2x64xf32> to vector<2x64xbf16>
    %cst_44 = arith.constant dense<0.000000e+00> : vector<2x128xf32>
    %167 = tpu.matmul %166, %10, %cst_44 {dimension_numbers = #tpu.dot_dimension_numbers<[1], [0], [0], [1], [0, 0, 1, 1], [], []>} : vector<2x64xbf16>, vector<64x128xbf16>, vector<2x128xf32> -> vector<2x128xf32>
    %168 = vector.extract_strided_slice %9 {offsets = [0, 7, 0], sizes = [2, 1, 128], strides = [1, 1, 1]} : vector<2x8x128xf32> to vector<2x1x128xf32>
    %169 = vector.shape_cast %168 : vector<2x1x128xf32> to vector<2x128xf32>
    %170 = arith.addf %167, %169 : vector<2x128xf32>
    %171 = arith.negf %170 : vector<2x128xf32>
    %172 = math.exp %171 : vector<2x128xf32>
    %cst_45 = arith.constant 1.000000e+00 : f32
    %173 = vector.broadcast %cst_45 : f32 to vector<2x128xf32>
    %174 = arith.addf %173, %172 : vector<2x128xf32>
    %175 = arith.divf %173, %174 : vector<2x128xf32>
    %176 = vector.extract_strided_slice %175 {offsets = [0, 0], sizes = [2, 64], strides = [1, 1]} : vector<2x128xf32> to vector<2x64xf32>
    %177 = vector.extract_strided_slice %175 {offsets = [0, 64], sizes = [2, 64], strides = [1, 1]} : vector<2x128xf32> to vector<2x64xf32>
    %cst_46 = arith.constant 2.000000e+00 : f32
    %178 = vector.broadcast %cst_46 : f32 to vector<2x64xf32>
    %179 = arith.mulf %178, %177 : vector<2x64xf32>
    %cst_47 = arith.constant 1.000000e+00 : f32
    %180 = vector.broadcast %cst_47 : f32 to vector<2x64xf32>
    %181 = arith.subf %179, %180 : vector<2x64xf32>
    %cst_48 = arith.constant 1.000000e+00 : f32
    %182 = vector.broadcast %cst_48 : f32 to vector<2x64xf32>
    %183 = arith.subf %182, %176 : vector<2x64xf32>
    %184 = arith.mulf %183, %164 : vector<2x64xf32>
    %185 = arith.mulf %176, %181 : vector<2x64xf32>
    %186 = arith.addf %184, %185 : vector<2x64xf32>
    %187 = vector.extract_strided_slice %186 {offsets = [0, 0], sizes = [2, 32], strides = [1, 1]} : vector<2x64xf32> to vector<2x32xf32>
    %188 = vector.extract_strided_slice %186 {offsets = [0, 32], sizes = [2, 32], strides = [1, 1]} : vector<2x64xf32> to vector<2x32xf32>
    %189 = vector.shape_cast %33 : vector<2x32xf32> to vector<2x1x32xf32>
    %190 = vector.shape_cast %55 : vector<2x32xf32> to vector<2x1x32xf32>
    %191 = vector.shape_cast %77 : vector<2x32xf32> to vector<2x1x32xf32>
    %192 = vector.shape_cast %99 : vector<2x32xf32> to vector<2x1x32xf32>
    %193 = vector.shape_cast %121 : vector<2x32xf32> to vector<2x1x32xf32>
    %194 = vector.shape_cast %143 : vector<2x32xf32> to vector<2x1x32xf32>
    %195 = vector.shape_cast %165 : vector<2x32xf32> to vector<2x1x32xf32>
    %196 = vector.shape_cast %187 : vector<2x32xf32> to vector<2x1x32xf32>
    %197 = tpu.concatenate %189, %190, %191, %192, %193, %194, %195, %196 in 1 : vector<2x1x32xf32>, vector<2x1x32xf32>, vector<2x1x32xf32>, vector<2x1x32xf32>, vector<2x1x32xf32>, vector<2x1x32xf32>, vector<2x1x32xf32>, vector<2x1x32xf32> -> vector<2x8x32xf32>
    %c0_49 = arith.constant 0 : index
    %c0_50 = arith.constant 0 : index
    %198 = vector.load %arg4[%c0_49, %c0_50] : memref<1x32xf32, #tpu.memory_space<vmem>>, vector<1x32xf32>
    %199 = vector.shape_cast %198 : vector<1x32xf32> to vector<1x1x32xf32>
    %200 = vector.broadcast %199 : vector<1x1x32xf32> to vector<2x8x32xf32>
    %201 = arith.mulf %197, %200 : vector<2x8x32xf32>
    %cst_51 = arith.constant dense<0.000000e+00> : vector<2x8xf32>
    %202 = vector.multi_reduction <add>, %201, %cst_51 [2] : vector<2x8x32xf32> to vector<2x8xf32>
    %cst_52 = arith.constant dense<0xFF800000> : vector<2xf32>
    %203 = vector.multi_reduction <maximumf>, %202, %cst_52 [1] : vector<2x8xf32> to vector<2xf32>
    %204 = vector.shape_cast %203 : vector<2xf32> to vector<2x1xf32>
    %205 = vector.broadcast %204 : vector<2x1xf32> to vector<2x8xf32>
    %206 = arith.subf %202, %205 : vector<2x8xf32>
    %207 = math.exp %206 : vector<2x8xf32>
    %cst_53 = arith.constant dense<0.000000e+00> : vector<2xf32>
    %208 = vector.multi_reduction <add>, %207, %cst_53 [1] : vector<2x8xf32> to vector<2xf32>
    %209 = vector.shape_cast %208 : vector<2xf32> to vector<2x1xf32>
    %210 = vector.broadcast %209 : vector<2x1xf32> to vector<2x8xf32>
    %211 = arith.divf %207, %210 : vector<2x8xf32>
    %c0_54 = arith.constant 0 : index
    %c0_55 = arith.constant 0 : index
    %212 = vector.load %arg11[%c0_54, %c0_55] : memref<2x8xf32, #tpu.memory_space<vmem>>, vector<2x8xf32>
    tpu.vector_store %arg11[%c0_54, %c0_55], %211 {strides = array<i32>} : memref<2x8xf32, #tpu.memory_space<vmem>>, vector<2x8xf32>,
    %213 = vector.shape_cast %211 : vector<2x8xf32> to vector<2x8x1xf32>
    %214 = vector.broadcast %213 : vector<2x8x1xf32> to vector<2x8x32xf32>
    %215 = arith.mulf %214, %197 : vector<2x8x32xf32>
    %cst_56 = arith.constant dense<0.000000e+00> : vector<2x32xf32>
    %216 = vector.multi_reduction <add>, %215, %cst_56 [1] : vector<2x8x32xf32> to vector<2x32xf32>
    %c0_57 = arith.constant 0 : index
    %c0_58 = arith.constant 0 : index
    %217 = vector.load %arg5[%c0_57, %c0_58] : memref<32x32xf32, #tpu.memory_space<vmem>>, vector<32x32xf32>
    %cst_59 = arith.constant dense<0.000000e+00> : vector<2x32xf32>
    %218 = tpu.matmul %216, %217, %cst_59 {dimension_numbers = #tpu.dot_dimension_numbers<[1], [0], [0], [1], [0, 0, 1, 1], [], []>} : vector<2x32xf32>, vector<32x32xf32>, vector<2x32xf32> -> vector<2x32xf32>
    %c0_60 = arith.constant 0 : index
    %c0_61 = arith.constant 0 : index
    %219 = vector.load %arg6[%c0_60, %c0_61] : memref<32x32xf32, #tpu.memory_space<vmem>>, vector<32x32xf32>
    %cst_62 = arith.constant dense<0.000000e+00> : vector<2x32xf32>
    %220 = tpu.matmul %188, %219, %cst_62 {dimension_numbers = #tpu.dot_dimension_numbers<[1], [0], [0], [1], [0, 0, 1, 1], [], []>} : vector<2x32xf32>, vector<32x32xf32>, vector<2x32xf32> -> vector<2x32xf32>
    %221 = arith.addf %218, %220 : vector<2x32xf32>
    %c0_63 = arith.constant 0 : index
    %c0_64 = arith.constant 0 : index
    %222 = vector.load %arg7[%c0_63, %c0_64] : memref<1x32xf32, #tpu.memory_space<vmem>>, vector<1x32xf32>
    %223 = vector.broadcast %222 : vector<1x32xf32> to vector<2x32xf32>
    %224 = arith.addf %221, %223 : vector<2x32xf32>
    %cst_65 = arith.constant 0.000000e+00 : f32
    %225 = vector.broadcast %cst_65 : f32 to vector<2x32xf32>
    %226 = arith.maximumf %224, %225 : vector<2x32xf32>
    %c0_66 = arith.constant 0 : index
    %c0_67 = arith.constant 0 : index
    %227 = vector.load %arg8[%c0_66, %c0_67] : memref<32x3xf32, #tpu.memory_space<vmem>>, vector<32x3xf32>
    %cst_68 = arith.constant dense<0.000000e+00> : vector<2x3xf32>
    %228 = tpu.matmul %226, %227, %cst_68 {dimension_numbers = #tpu.dot_dimension_numbers<[1], [0], [0], [1], [0, 0, 1, 1], [], []>} : vector<2x32xf32>, vector<32x3xf32>, vector<2x3xf32> -> vector<2x3xf32>
    %c0_69 = arith.constant 0 : index
    %c0_70 = arith.constant 0 : index
    %229 = vector.load %arg9[%c0_69, %c0_70] : memref<1x3xf32, #tpu.memory_space<vmem>>, vector<1x3xf32>
    %230 = vector.broadcast %229 : vector<1x3xf32> to vector<2x3xf32>
    %231 = arith.addf %228, %230 : vector<2x3xf32>
    %c0_71 = arith.constant 0 : index
    %c0_72 = arith.constant 0 : index
    %232 = vector.load %arg10[%c0_71, %c0_72] : memref<2x3xf32, #tpu.memory_space<vmem>>, vector<2x3xf32>
    tpu.vector_store %arg10[%c0_71, %c0_72], %231 {strides = array<i32>} : memref<2x3xf32, #tpu.memory_space<vmem>>, vector<2x3xf32>,
    return
  }
}

</mosaic_0001>

<bundles_post_ra>
// kernel: tpu_custom_call.1
= control target key start
LH: loop header
LB: loop body
LE: loop exit
PB: predicated region body
PF: predicated region fallthrough
CT: control target
= control target key end

     0   :  { %17 = vsyncpa [#allocation3], 0  ;;  %s2353_s0 = inlined_call_operand.hbm [shape: f32[2,8,64], index: 0, kind: input, shape index: {}]   ;;  %s2354_s1 = inlined_call_operand.vmem [shape: bf16[64,128], index: 1, kind: input, shape index: {}]   ;;  %s2355_s2 = inlined_call_operand.vmem [shape: f32[8,128], index: 2, kind: input, shape index: {}]   ;;  %s2356_s3 = inlined_call_operand.hbm [shape: bf16[64,128], index: 3, kind: input, shape index: {}]   ;;  %s2357_s4 = inlined_call_operand.vmem [shape: f32[1,32], index: 4, kind: input, shape index: {}]   ;;  %s2358_s5 = inlined_call_operand.hbm [shape: f32[32,32], index: 5, kind: input, shape index: {}]   ;;  %s2359_s6 = inlined_call_operand.hbm [shape: f32[32,32], index: 6, kind: input, shape index: {}]   ;;  %s2360_s7 = inlined_call_operand.vmem [shape: f32[1,32], index: 7, kind: input, shape index: {}]   ;;  %s2361_s8 = inlined_call_operand.vmem [shape: f32[32,3], index: 8, kind: input, shape index: {}]   ;;  %s2362_s9 = inlined_call_operand.vmem [shape: f32[1,3], index: 9, kind: input, shape index: {}]   ;;  %s2363_s10 = inlined_call_operand.hbm [shape: f32[2,3], index: 10, kind: output, shape index: {0}]   ;;  %s2364_s11 = inlined_call_operand.hbm [shape: f32[2,8], index: 11, kind: output, shape index: {1}]  }
   0x1   :  { %18 = vsyncpa [#allocation6], 0 }
   0x2   :  { %19 = vsyncpa [#allocation9], 0 }
   0x3   :  { %20 = vsyncpa [#allocation4], 0 }
   0x4   :  { %21 = vsyncpa [#allocation12], 0  ;;  %s1879_s17 = smov [#allocation5]   ;;  %s1737_s21 = scalar_lea.hbm %s2356_s3, 512 }
   0x5   :  { %s43_s18 = sshll.u32 %s1879_s17, 4  ;;  %p1738_p0 = scmp.ne.s32.totalorder %s2356_s3, %s1737_s21  ;;  %s44_s18 = int_to_ptr.vmem [resolvable:$true] %s43_s18 }
   0x6   :  { %p1741_p1 = scmp.lt.u32.totalorder %s1737_s21, %s2356_s3 }
   0x8   :  { %p1743_p2 = pnand %p1741_p1, %p1738_p0 }
   0xa   :  { %1746 = shalt.err (!%p1743_p2)
}
   0xb   :  { %s1747_s26 = scalar_lea.vmem %s44_s18, 512  ;;  %p1752_p4 = scmp.lt.s32.totalorder %s44_s18, %s44_s18 }
   0xc   :  { %p1748_p3 = scmp.ne.s32.totalorder %s44_s18, %s1747_s26  ;;  %p1753_p5 = scmp.lt.s32.totalorder %s1747_s26, %s1747_s26 }
   0xe   :  { %p1754_p6 = por %p1753_p5, %p1752_p4 }
  0x10   :  { %p1755_p7 = pnand %p1754_p6, %p1748_p3 }
  0x12   :  { %1758 = shalt.err (!%p1755_p7)
}
  0x13   :  { %s1880_s27 = smov 64   ;;  %s1881_s28 = smov 4  }
  0x14   :  { %49 = dma.hbm_to_vmem [thread:$0]  %s2356_s3, 512, %s44_s18, [#allocation6], %s1880_s27, %s1880_s27, %s1881_s28  }
  0x15   :  { %s1882_s12 = smov [#allocation2]   ;;  %s1759_s16 = scalar_lea.hbm %s2353_s0, 256 }
  0x16   :  { %s27_s13 = sshll.u32 %s1882_s12, 4  ;;  %p1760_p8 = scmp.ne.s32.totalorder %s2353_s0, %s1759_s16  ;;  %s28_s13 = int_to_ptr.vmem [resolvable:$true] %s27_s13 }
  0x17   :  { %p1763_p9 = scmp.lt.u32.totalorder %s1759_s16, %s2353_s0 }
  0x19   :  { %p1765_p10 = pnand %p1763_p9, %p1760_p8 }
  0x1b   :  { %1768 = shalt.err (!%p1765_p10)
}
  0x1c   :  { %s1769_s22 = scalar_lea.vmem %s28_s13, 256  ;;  %p1774_p12 = scmp.lt.s32.totalorder %s28_s13, %s28_s13 }
  0x1d   :  { %p1770_p11 = scmp.ne.s32.totalorder %s28_s13, %s1769_s22  ;;  %p1775_p13 = scmp.lt.s32.totalorder %s1769_s22, %s1769_s22 }
  0x1f   :  { %p1776_p0 = por %p1775_p13, %p1774_p12 }
  0x21   :  { %p1777_p1 = pnand %p1776_p0, %p1770_p11 }
  0x23   :  { %1780 = shalt.err (!%p1777_p1)
}
  0x24   :  { %s1883_s3 = smov 128   ;;  %s1884_s18 = smov 8  }
  0x25   :  { %33 = dma.hbm_to_vmem [thread:$0]  %s2353_s0, 256, %s28_s13, [#allocation3], %s1883_s3, %s1883_s3, %s1884_s18  }
  0x26   :  { %s1885_s25 = smov [#allocation7]   ;;  %s1886_s28 = smov [#allocation8]  }
  0x27   :  { %s57_s26 = sshll.u32 %s1885_s25, 4  ;;  %s69_s29 = sshll.u32 %s1886_s28, 4  ;;  %s58_s26 = int_to_ptr.vmem [resolvable:$true] %s57_s26  ;;  %s1984_s29 = int_to_ptr.vmem [resolvable:$true] %s69_s29 }
  0x28   :  { %s1781_s14 = scalar_lea.hbm %s2358_s5, 512 }
  0x29   :  { %p1782_p2 = scmp.ne.s32.totalorder %s2358_s5, %s1781_s14  ;;  %p1785_p3 = scmp.lt.u32.totalorder %s1781_s14, %s2358_s5 }
  0x2b   :  { %p1787_p4 = pnand %p1785_p3, %p1782_p2 }
  0x2d   :  { %1790 = shalt.err (!%p1787_p4)
}
  0x2e   :  { %s1791_s0 = scalar_lea.vmem %s58_s26, 512  ;;  %p1796_p6 = scmp.lt.s32.totalorder %s58_s26, %s58_s26 }
  0x2f   :  { %p1792_p5 = scmp.ne.s32.totalorder %s58_s26, %s1791_s0  ;;  %p1797_p7 = scmp.lt.s32.totalorder %s1791_s0, %s1791_s0 }
  0x31   :  { %p1798_p8 = por %p1797_p7, %p1796_p6 }
  0x33   :  { %p1799_p9 = pnand %p1798_p8, %p1792_p5 }
  0x35   :  { %1802 = shalt.err (!%p1799_p9)
}
  0x36   :  { %63 = dma.hbm_to_vmem [thread:$0]  %s2358_s5, 512, %s58_s26, [#allocation6], %s1883_s3, %s1883_s3, %s1884_s18  }
  0x37   :  { %s1803_s23 = scalar_lea.hbm %s2359_s6, 512 }
  0x38   :  { %p1804_p10 = scmp.ne.s32.totalorder %s2359_s6, %s1803_s23  ;;  %p1807_p11 = scmp.lt.u32.totalorder %s1803_s23, %s2359_s6 }
  0x3a   :  { %p1809_p12 = pnand %p1807_p11, %p1804_p10 }
  0x3c   :  { %1812 = shalt.err (!%p1809_p12)
}
  0x3d   :  { %s1813_s12 = scalar_lea.vmem %s1984_s29, 512  ;;  %p1818_p0 = scmp.lt.s32.totalorder %s1984_s29, %s1984_s29 }
  0x3e   :  { %p1814_p13 = scmp.ne.s32.totalorder %s1984_s29, %s1813_s12  ;;  %p1819_p1 = scmp.lt.s32.totalorder %s1813_s12, %s1813_s12 }
  0x40   :  { %p1820_p2 = por %p1819_p1, %p1818_p0 }
  0x42   :  { %p1821_p3 = pnand %p1820_p2, %p1814_p13 }
  0x44   :  { %1824 = shalt.err (!%p1821_p3)
}
  0x45   :  { %75 = dma.hbm_to_vmem [thread:$0]  %s2359_s6, 512, %s1984_s29, [#allocation9], %s1883_s3, %s1883_s3, %s1884_s18  }
  0x46   :  { %1869 = dma.done.wait [#allocation3], 256  }
  0x47   :  { %1870 = vsyncadd [#allocation3], 4294967040 }
  0x48   :  { %1871 = dma.done.wait [#allocation6], 1024  }
  0x49   :  { %1872 = vsyncadd [#allocation6], 4294966272 }
  0x4a   :  { %1873 = dma.done.wait [#allocation9], 512  }
  0x4b   :  { %1874 = vsyncadd [#allocation9], 4294966784  ;;  %v1887_v0 = vmov 0.0   ;;  %vm1888_vm0 = vmmov 0   ;;  %v1889_v1 = vmov 0   ;;  %v1689_v2 = vld [vmem:[%s2354_s1] sm:$0xff]  }
  0x4c   :  { %1512 = vmatprep.subr.bf16.mxu0 %v1887_v0  ;;  %1524 = vmatprep.subr.bf16.mxu1 %v1887_v0  ;;  %v1690_v3 = vld [vmem:[%s2354_s1 + $0x8] sm:$0xff]   ;;  %v2033_v4 = vld [vmem:[#allocation5] sm:$0xff]   ;;  %v2037_v5 = vld [vmem:[#allocation5 + $0x8] sm:$0xff]   ;;  %vm136_vm1 = vcmask 523264   ;;  %vm219_vm2 = vcmask 1041409   ;;  %vm984_vm3 = vcmask 1040384  }
  0x4d   :  { %1520 = vmatprep.mubr.msk.bf16.mxu0 %vm1888_vm0, %v1887_v0  ;;  %1532 = vmatprep.mubr.msk.bf16.mxu1 %vm1888_vm0, %v1887_v0  ;;  %v1692_v6 = vld [vmem:[%s2354_s1 + $0x10] sm:$0xff]   ;;  %v2045_v7 = vld [vmem:[#allocation5 + $0x10] sm:$0xff]   ;;  %v1694_v8 = vld [vmem:[%s2354_s1 + $0x18] sm:$0xff]   ;;  %vm987_vm4 = vcmask 1041408   ;;  %vm990_vm5 = vcmask 1042432   ;;  %vm993_vm6 = vcmask 1043456  }
  0x4e   :  { %1688 = vset.pattern.permute.xlu1 %v1889_v1  ;;  %1687 = vset.pattern.permute.xlu0 %v1889_v1  ;;  %v95_v9 = vld [vmem:[#allocation2] sm:$0xff]  ;;  %v96_v10 = vld [vmem:[#allocation2 + $0x8] sm:$0xff]  ;;  %vm996_vm7 = vcmask 1044480   ;;  %vm999_vm8 = vcmask 1045504   ;;  %vm1002_vm9 = vcmask 1046528   ;;  %vm1014_vm10 = vcmask 261120  }
  0x4f   :  { %1513 = vmatpush3.bf16.msra.mxu0 %v1689_v2  ;;  %1525 = vmatpush3.bf16.msra.mxu1 %v2033_v4  ;;  %v2053_v11 = vld [vmem:[#allocation5 + $0x18] sm:$0xff]   ;;  %v1451_v12 = vpack.c.bf16 %v96_v10, %v95_v9  ;;  %v181_v13 = vld [vmem:[%s2355_s2] sm:$0xff]  ;;  %vm1035_vm11 = vcmask 58368   ;;  %s1893_s12 = smov [#allocation11]  }
  0x50   :  { %1514 = vmatprep.subr.bf16.mxu0 %v1887_v0  ;;  %1526 = vmatprep.subr.bf16.mxu1 %v1887_v0  ;;  %s1397_s5 = sshll.u32 %s1893_s12, 4  ;;  %s1398_s5 = int_to_ptr.vmem [resolvable:$true] %s1397_s5 }
  0x51   :  { %s1825_s26 = scalar_lea.vmem %s1398_s5, 32  ;;  %p1830_p5 = scmp.lt.s32.totalorder %s1398_s5, %s1398_s5 }
  0x52   :  { %p1826_p4 = scmp.ne.s32.totalorder %s1398_s5, %s1825_s26  ;;  %p1831_p6 = scmp.lt.s32.totalorder %s1825_s26, %s1825_s26 }
  0x53   :  { %1515 = vmatpush3.bf16.msra.mxu0 %v1690_v3  ;;  %1527 = vmatpush3.bf16.msra.mxu1 %v2037_v5 }
  0x54   :  { %1516 = vmatprep.subr.bf16.mxu0 %v1887_v0  ;;  %1528 = vmatprep.subr.bf16.mxu1 %v1887_v0  ;;  %p1832_p7 = por %p1831_p6, %p1830_p5 }
  0x56   :  { %p1833_p8 = pnand %p1832_p7, %p1826_p4 }
  0x57   :  { %1517 = vmatpush3.bf16.msra.mxu0 %v1692_v6  ;;  %1529 = vmatpush3.bf16.msra.mxu1 %v2045_v7 }
  0x58   :  { %1518 = vmatprep.subr.bf16.mxu0 %v1887_v0  ;;  %1530 = vmatprep.subr.bf16.mxu1 %v1887_v0 }
  0x5b   :  { %1519 = vmatpush3.bf16.msra.mxu0 %v1694_v8  ;;  %1531 = vmatpush3.bf16.msra.mxu1 %v2053_v11 }
  0x5c   :  { %1536 = vmatprep.subr.bf16.mxu0 %v1887_v0  ;;  %1548 = vmatprep.subr.bf16.mxu1 %v1887_v0 }
  0x5e   :  { %1521 = vmatmul.mubr.msk.bf16.vlgmr.msra.gmra.mrb[0].mxu0 %vm136_vm1, %v1451_v12  ;;  %1533 = vmatmul.mubr.bf16.vlgmr.msra.gmra.mrb[0].mxu1 %v1889_v1 }
  0x5f   :  { %1537 = vmatpush3.bf16.msra.mxu0 %v2033_v4  ;;  %1544 = vmatprep.mubr.msk.bf16.mxu0 %vm1888_vm0, %v1887_v0 }
  0x60   :  { %1538 = vmatprep.subr.bf16.mxu0 %v1887_v0  ;;  %1549 = vmatpush3.bf16.msra.mxu1 %v2033_v4 }
  0x61   :  { %1556 = vmatprep.mubr.msk.bf16.mxu1 %vm1888_vm0, %v1887_v0  ;;  %1550 = vmatprep.subr.bf16.mxu1 %v1887_v0 }
  0x63   :  { %1539 = vmatpush3.bf16.msra.mxu0 %v2037_v5 }
  0x64   :  { %1540 = vmatprep.subr.bf16.mxu0 %v1887_v0  ;;  %1551 = vmatpush3.bf16.msra.mxu1 %v2037_v5 }
  0x65   :  { %1552 = vmatprep.subr.bf16.mxu1 %v1887_v0 }
  0x67   :  { %1541 = vmatpush3.bf16.msra.mxu0 %v2045_v7 }
  0x68   :  { %1542 = vmatprep.subr.bf16.mxu0 %v1887_v0  ;;  %1553 = vmatpush3.bf16.msra.mxu1 %v2045_v7 }
  0x69   :  { %1554 = vmatprep.subr.bf16.mxu1 %v1887_v0 }
  0x6b   :  { %1543 = vmatpush3.bf16.msra.mxu0 %v2053_v11 }
  0x6c   :  { %1560 = vmatprep.subr.bf16.mxu0 %v1887_v0  ;;  %1555 = vmatpush3.bf16.msra.mxu1 %v2053_v11 }
  0x6d   :  { %1572 = vmatprep.subr.bf16.mxu1 %v1887_v0 }
 0x131   :  { %v174_v14 = vpop.f32.mrb[0].mxu0  ;;  %v259_v18 = vpop.f32.mrb[0].mxu1 }
 0x132   :  { %v182_v15 = vadd.f32 %v181_v13, %v174_v14  ;;  %v1522_v16 = vpop.f32.mrb[1].mxu0  ;;  %v1534_v21 = vpop.f32.mrb[1].mxu1 }
 0x133   :  { %v177_v17 = vpop.f32.mrb[2].mxu0  ;;  %v262_v24 = vpop.f32.mrb[2].mxu1 }
 0x134   :  { %v183_v19 = vadd.f32 %v181_v13, %v177_v17  ;;  %v1523_v20 = vpop.f32.mrb[3].mxu0  ;;  %v282_v22 = vrot.slane %v182_v15, 1  ;;  %v345_v23 = vrot.slane %v182_v15, 2  ;;  %v409_v25 = vrot.slane %v182_v15, 3  ;;  %v1535_v30 = vpop.f32.mrb[3].mxu1 }
 0x135   :  { %v473_v26 = vrot.slane %v182_v15, 4  ;;  %v537_v27 = vrot.slane %v182_v15, 5  ;;  %v601_v28 = vrot.slane %v182_v15, 6  ;;  %v665_v41 = vrot.slane %v182_v15, 7 }
 0x136   :  { %v218_v29 = vrot.slane %v183_v19, 7  ;;  %v283_v31 = vsel %vm219_vm2, %v183_v19, %v282_v22  ;;  %v346_v32 = vrot.slane %v183_v19, 1  ;;  %v410_v33 = vrot.slane %v183_v19, 2 }
 0x137   :  { %v474_v34 = vrot.slane %v183_v19, 3  ;;  %v538_v35 = vrot.slane %v183_v19, 4  ;;  %v602_v36 = vrot.slane %v183_v19, 5  ;;  %v666_v37 = vrot.slane %v183_v19, 6 }
 0x138   :  { %v220_v38 = vsel %vm219_vm2, %v218_v29, %v182_v15  ;;  %v2086_v39 = vsel %vm219_vm2, %v346_v32, %v345_v23  ;;  %v2089_v40 = vsel %vm219_vm2, %v410_v33, %v409_v25 }
 0x139   :  { %v260_v42 = vadd.f32 %v259_v18, %v220_v38  ;;  %v2092_v43 = vsel %vm219_vm2, %v474_v34, %v473_v26  ;;  %v2095_v44 = vsel %vm219_vm2, %v538_v35, %v537_v27  ;;  %v2098_v45 = vsel %vm219_vm2, %v602_v36, %v601_v28 }
 0x13a   :  { %v2101_v46 = vsel %vm219_vm2, %v666_v37, %v665_v41 }
 0x13b   :  { %v1422_v47 = vmul.f32 -1.442695, %v260_v42 }
 0x13d   :  { %1697 = vpow2.f32 %v1422_v47 }
 0x147   :  { %v1698_v48 = vpop.eup %1697 }
 0x148   :  { %v268_v49 = vadd.f32 1.0, %v1698_v48 }
 0x14a   :  { %1699 = vrcp.f32 %v268_v49 }
 0x154   :  { %v1700_v50 = vpop.eup %1699 }
 0x155   :  { %v271_v51 = vmul.f32 2.0, %v1700_v50  ;;  %v273_v53 = vsub.f32 1.0, %v1700_v50 }
 0x157   :  { %v1423_v52 = vadd.f32 -1.0, %v271_v51  ;;  %v274_v55 = vmul.f32 0.0, %v273_v53 }
 0x159   :  { %276 = vrot.lane.b32.xlu0 %v1423_v52, %s1880_s27 }
 0x1cb   :  { %v277_v54 = vpop.permute.xlu0 %276 }
 0x1cc   :  { %v279_v56 = vmul.f32 %v1700_v50, %v277_v54 }
 0x1ce   :  { %v2104_v57 = vadd.f32 %v279_v56, %v274_v55 }
 0x1d0   :  { %v281_v58 = vpack.c.bf16 %v2104_v57, %v2104_v57 }
 0x1d2   :  { %1545 = vmatmul.mubr.msk.bf16.vlgmr.msra.gmra.mrb[4].mxu0 %vm136_vm1, %v281_v58 }
 0x1d3   :  { %1561 = vmatpush3.bf16.msra.mxu0 %v2033_v4  ;;  %1568 = vmatprep.mubr.msk.bf16.mxu0 %vm1888_vm0, %v1887_v0 }
 0x1d4   :  { %1562 = vmatprep.subr.bf16.mxu0 %v1887_v0 }
 0x1d7   :  { %1563 = vmatpush3.bf16.msra.mxu0 %v2037_v5 }
 0x1d8   :  { %1564 = vmatprep.subr.bf16.mxu0 %v1887_v0 }
 0x1db   :  { %1565 = vmatpush3.bf16.msra.mxu0 %v2045_v7 }
 0x1dc   :  { %1566 = vmatprep.subr.bf16.mxu0 %v1887_v0 }
 0x1df   :  { %1567 = vmatpush3.bf16.msra.mxu0 %v2053_v11 }
 0x1e0   :  { %1584 = vmatprep.subr.bf16.mxu0 %v1887_v0 }
 0x2a5   :  { %v322_v59 = vpop.f32.mrb[4].mxu0 }
 0x2a6   :  { %v323_v60 = vadd.f32 %v322_v59, %v283_v31  ;;  %v1546_v61 = vpop.f32.mrb[5].mxu0 }
 0x2a7   :  { %v325_v62 = vpop.f32.mrb[6].mxu0 }
 0x2a8   :  { %v1425_v63 = vmul.f32 -1.442695, %v323_v60  ;;  %v1547_v1 = vpop.f32.mrb[7].mxu0 }
 0x2aa   :  { %1701 = vpow2.f32 %v1425_v63 }
 0x2b4   :  { %v1702_v2 = vpop.eup %1701 }
 0x2b5   :  { %v331_v3 = vadd.f32 1.0, %v1702_v2 }
 0x2b7   :  { %1703 = vrcp.f32 %v331_v3 }
 0x2c1   :  { %v1704_v6 = vpop.eup %1703 }
 0x2c2   :  { %v334_v8 = vmul.f32 2.0, %v1704_v6  ;;  %v336_v10 = vsub.f32 1.0, %v1704_v6 }
 0x2c4   :  { %v1426_v9 = vadd.f32 -1.0, %v334_v8  ;;  %v337_v13 = vmul.f32 %v336_v10, %v2104_v57 }
 0x2c6   :  { %339 = vrot.lane.b32.xlu0 %v1426_v9, %s1880_s27 }
 0x338   :  { %v340_v12 = vpop.permute.xlu0 %339 }
 0x339   :  { %v342_v14 = vmul.f32 %v1704_v6, %v340_v12 }
 0x33b   :  { %v2121_v15 = vadd.f32 %v342_v14, %v337_v13 }
 0x33d   :  { %v344_v16 = vpack.c.bf16 %v2121_v15, %v2121_v15 }
 0x33f   :  { %1557 = vmatmul.mubr.msk.bf16.vlgmr.msra.gmra.mrb[4].mxu1 %vm136_vm1, %v344_v16 }
 0x340   :  { %1573 = vmatpush3.bf16.msra.mxu1 %v2033_v4  ;;  %1580 = vmatprep.mubr.msk.bf16.mxu1 %vm1888_vm0, %v1887_v0 }
 0x341   :  { %1574 = vmatprep.subr.bf16.mxu1 %v1887_v0 }
 0x344   :  { %1575 = vmatpush3.bf16.msra.mxu1 %v2037_v5 }
 0x345   :  { %1576 = vmatprep.subr.bf16.mxu1 %v1887_v0 }
 0x348   :  { %1577 = vmatpush3.bf16.msra.mxu1 %v2045_v7 }
 0x349   :  { %1578 = vmatprep.subr.bf16.mxu1 %v1887_v0 }
 0x34c   :  { %1579 = vmatpush3.bf16.msra.mxu1 %v2053_v11 }
 0x34d   :  { %1596 = vmatprep.subr.bf16.mxu1 %v1887_v0 }
 0x412   :  { %v386_v17 = vpop.f32.mrb[4].mxu1 }
 0x413   :  { %v387_v18 = vadd.f32 %v386_v17, %v2086_v39  ;;  %v1558_v19 = vpop.f32.mrb[5].mxu1 }
 0x414   :  { %v389_v20 = vpop.f32.mrb[6].mxu1 }
 0x415   :  { %v1428_v21 = vmul.f32 -1.442695, %v387_v18  ;;  %v1559_v22 = vpop.f32.mrb[7].mxu1 }
 0x417   :  { %1705 = vpow2.f32 %v1428_v21 }
 0x421   :  { %v1706_v23 = vpop.eup %1705 }
 0x422   :  { %v395_v24 = vadd.f32 1.0, %v1706_v23 }
 0x424   :  { %1707 = vrcp.f32 %v395_v24 }
 0x42e   :  { %v1708_v25 = vpop.eup %1707 }
 0x42f   :  { %v398_v26 = vmul.f32 2.0, %v1708_v25  ;;  %v400_v28 = vsub.f32 1.0, %v1708_v25 }
 0x431   :  { %v1429_v27 = vadd.f32 -1.0, %v398_v26  ;;  %v401_v30 = vmul.f32 %v400_v28, %v2121_v15 }
 0x433   :  { %403 = vrot.lane.b32.xlu1 %v1429_v27, %s1880_s27 }
 0x4a5   :  { %v404_v29 = vpop.permute.xlu1 %403 }
 0x4a6   :  { %v406_v31 = vmul.f32 %v1708_v25, %v404_v29 }
 0x4a8   :  { %v2139_v32 = vadd.f32 %v406_v31, %v401_v30 }
 0x4aa   :  { %v408_v33 = vpack.c.bf16 %v2139_v32, %v2139_v32 }
 0x4ac   :  { %1569 = vmatmul.mubr.msk.bf16.vlgmr.msra.gmra.mrb[8].mxu0 %vm136_vm1, %v408_v33 }
 0x4ad   :  { %1585 = vmatpush3.bf16.msra.mxu0 %v2033_v4  ;;  %1592 = vmatprep.mubr.msk.bf16.mxu0 %vm1888_vm0, %v1887_v0 }
 0x4ae   :  { %1586 = vmatprep.subr.bf16.mxu0 %v1887_v0 }
 0x4b1   :  { %1587 = vmatpush3.bf16.msra.mxu0 %v2037_v5 }
 0x4b2   :  { %1588 = vmatprep.subr.bf16.mxu0 %v1887_v0 }
 0x4b5   :  { %1589 = vmatpush3.bf16.msra.mxu0 %v2045_v7 }
 0x4b6   :  { %1590 = vmatprep.subr.bf16.mxu0 %v1887_v0 }
 0x4b9   :  { %1591 = vmatpush3.bf16.msra.mxu0 %v2053_v11 }
 0x4ba   :  { %1608 = vmatprep.subr.bf16.mxu0 %v1887_v0 }
 0x57f   :  { %v450_v34 = vpop.f32.mrb[8].mxu0 }
 0x580   :  { %v451_v35 = vadd.f32 %v450_v34, %v2089_v40  ;;  %v1570_v36 = vpop.f32.mrb[9].mxu0 }
 0x581   :  { %v453_v37 = vpop.f32.mrb[10].mxu0 }
 0x582   :  { %v1431_v38 = vmul.f32 -1.442695, %v451_v35  ;;  %v1571_v39 = vpop.f32.mrb[11].mxu0 }
 0x584   :  { %1709 = vpow2.f32 %v1431_v38 }
 0x58e   :  { %v1710_v41 = vpop.eup %1709 }
 0x58f   :  { %v459_v42 = vadd.f32 1.0, %v1710_v41 }
 0x591   :  { %1711 = vrcp.f32 %v459_v42 }
 0x59b   :  { %v1712_v47 = vpop.eup %1711 }
 0x59c   :  { %v462_v48 = vmul.f32 2.0, %v1712_v47  ;;  %v464_v50 = vsub.f32 1.0, %v1712_v47 }
 0x59e   :  { %v1432_v49 = vadd.f32 -1.0, %v462_v48  ;;  %v465_v52 = vmul.f32 %v464_v50, %v2139_v32 }
 0x5a0   :  { %467 = vrot.lane.b32.xlu1 %v1432_v49, %s1880_s27 }
 0x612   :  { %v468_v51 = vpop.permute.xlu1 %467 }
 0x613   :  { %v470_v53 = vmul.f32 %v1712_v47, %v468_v51 }
 0x615   :  { %v2157_v54 = vadd.f32 %v470_v53, %v465_v52 }
 0x617   :  { %v472_v40 = vpack.c.bf16 %v2157_v54, %v2157_v54 }
 0x619   :  { %1581 = vmatmul.mubr.msk.bf16.vlgmr.msra.gmra.mrb[8].mxu1 %vm136_vm1, %v472_v40 }
 0x61a   :  { %1597 = vmatpush3.bf16.msra.mxu1 %v2033_v4  ;;  %1604 = vmatprep.mubr.msk.bf16.mxu1 %vm1888_vm0, %v1887_v0 }
 0x61b   :  { %1598 = vmatprep.subr.bf16.mxu1 %v1887_v0 }
 0x61e   :  { %1599 = vmatpush3.bf16.msra.mxu1 %v2037_v5 }
 0x61f   :  { %1600 = vmatprep.subr.bf16.mxu1 %v1887_v0 }
 0x622   :  { %1601 = vmatpush3.bf16.msra.mxu1 %v2045_v7 }
 0x623   :  { %1602 = vmatprep.subr.bf16.mxu1 %v1887_v0 }
 0x626   :  { %1603 = vmatpush3.bf16.msra.mxu1 %v2053_v11 }
 0x6ec   :  { %v514_v55 = vpop.f32.mrb[8].mxu1 }
 0x6ed   :  { %v515_v56 = vadd.f32 %v514_v55, %v2092_v43  ;;  %v1582_v58 = vpop.f32.mrb[9].mxu1 }
 0x6ee   :  { %v517_v59 = vpop.f32.mrb[10].mxu1 }
 0x6ef   :  { %v1434_v60 = vmul.f32 -1.442695, %v515_v56  ;;  %v1583_v61 = vpop.f32.mrb[11].mxu1 }
 0x6f1   :  { %1713 = vpow2.f32 %v1434_v60  ;;  %v1890_v60 = vmov 1966171168  }
 0x6f2   :  { %v730_v61 = vunpack.c.l.s4 %v1890_v60 }
 0x6fb   :  { %v1714_v62 = vpop.eup %1713 }
 0x6fc   :  { %v523_v63 = vadd.f32 1.0, %v1714_v62  ;;  %v732_v62 = vlaneseq }
 0x6fe   :  { %1715 = vrcp.f32 %v523_v63  ;;  %v731_v63 = vunpack.c.0.s8 %v730_v61  ;;  %v1445_v61 = vld [vmem:[%s2357_s4] ss:$0 sm:$0xff]  ;;  %s1892_s4 = smov 96  }
 0x708   :  { %v1716_v1 = vpop.eup %1715 }
 0x709   :  { %v526_v2 = vmul.f32 2.0, %v1716_v1  ;;  %v528_v6 = vsub.f32 1.0, %v1716_v1 }
 0x70b   :  { %v1435_v3 = vadd.f32 -1.0, %v526_v2  ;;  %v529_v9 = vmul.f32 %v528_v6, %v2157_v54 }
 0x70d   :  { %531 = vrot.lane.b32.xlu0 %v1435_v3, %s1880_s27 }
 0x77f   :  { %v532_v8 = vpop.permute.xlu0 %531 }
 0x780   :  { %v534_v10 = vmul.f32 %v1716_v1, %v532_v8  ;;  %v2202_v1 = vshrl.u32 %v732_v62, 7 }
 0x782   :  { %v2174_v12 = vadd.f32 %v534_v10, %v529_v9 }
 0x784   :  { %v536_v43 = vpack.c.bf16 %v2174_v12, %v2174_v12 }
 0x786   :  { %1593 = vmatmul.mubr.msk.bf16.vlgmr.msra.gmra.mrb[12].mxu0 %vm136_vm1, %v536_v43  ;;  %v2216_v43 = vsub.s32 0, %v2202_v1 }
 0x787   :  { %1609 = vmatpush3.bf16.msra.mxu0 %v2033_v4  ;;  %1616 = vmatprep.mubr.msk.bf16.mxu0 %vm1888_vm0, %v1887_v0 }
 0x788   :  { %1610 = vmatprep.subr.bf16.mxu0 %v1887_v0 }
 0x78b   :  { %1611 = vmatpush3.bf16.msra.mxu0 %v2037_v5 }
 0x78c   :  { %1612 = vmatprep.subr.bf16.mxu0 %v1887_v0 }
 0x78f   :  { %1613 = vmatpush3.bf16.msra.mxu0 %v2045_v7 }
 0x790   :  { %1614 = vmatprep.subr.bf16.mxu0 %v1887_v0 }
 0x793   :  { %1615 = vmatpush3.bf16.msra.mxu0 %v2053_v11 }
 0x859   :  { %v578_v13 = vpop.f32.mrb[12].mxu0 }
 0x85a   :  { %v579_v14 = vadd.f32 %v578_v13, %v2095_v44  ;;  %v1594_v16 = vpop.f32.mrb[13].mxu0 }
 0x85b   :  { %v581_v4 = vpop.f32.mrb[14].mxu0 }
 0x85c   :  { %v1437_v17 = vmul.f32 -1.442695, %v579_v14  ;;  %v1595_v18 = vpop.f32.mrb[15].mxu0 }
 0x85e   :  { %1717 = vpow2.f32 %v1437_v17 }
 0x868   :  { %v1718_v19 = vpop.eup %1717 }
 0x869   :  { %v587_v20 = vadd.f32 1.0, %v1718_v19 }
 0x86b   :  { %1719 = vrcp.f32 %v587_v20 }
 0x875   :  { %v1720_v5 = vpop.eup %1719 }
 0x876   :  { %v590_v21 = vmul.f32 2.0, %v1720_v5  ;;  %v592_v7 = vsub.f32 1.0, %v1720_v5 }
 0x878   :  { %v1438_v22 = vadd.f32 -1.0, %v590_v21  ;;  %v593_v11 = vmul.f32 %v592_v7, %v2174_v12 }
 0x87a   :  { %595 = vrot.lane.b32.xlu1 %v1438_v22, %s1880_s27 }
 0x8ec   :  { %v596_v23 = vpop.permute.xlu1 %595 }
 0x8ed   :  { %v598_v24 = vmul.f32 %v1720_v5, %v596_v23 }
 0x8ef   :  { %v599_v25 = vadd.f32 %v598_v24, %v593_v11 }
 0x8f1   :  { %v600_v44 = vpack.c.bf16 %v599_v25, %v599_v25 }
 0x8f3   :  { %1605 = vmatmul.mubr.msk.bf16.vlgmr.msra.gmra.mrb[12].mxu1 %vm136_vm1, %v600_v44 }
 0x8f4   :  { %1628 = vmatprep.mubr.msk.f32.mxu1 %vm1888_vm0, %v1887_v0 }
 0x9c6   :  { %v642_v26 = vpop.f32.mrb[12].mxu1 }
 0x9c7   :  { %v643_v27 = vadd.f32 %v642_v26, %v2098_v45  ;;  %v1606_v28 = vpop.f32.mrb[13].mxu1 }
 0x9c8   :  { %v645_v29 = vpop.f32.mrb[14].mxu1 }
 0x9c9   :  { %v1440_v30 = vmul.f32 -1.442695, %v643_v27  ;;  %v1607_v31 = vpop.f32.mrb[15].mxu1 }
 0x9cb   :  { %1721 = vpow2.f32 %v1440_v30 }
 0x9d5   :  { %v1722_v33 = vpop.eup %1721 }
 0x9d6   :  { %v651_v34 = vadd.f32 1.0, %v1722_v33 }
 0x9d8   :  { %1723 = vrcp.f32 %v651_v34 }
 0x9e2   :  { %v1724_v35 = vpop.eup %1723 }
 0x9e3   :  { %v654_v36 = vmul.f32 2.0, %v1724_v35  ;;  %v656_v38 = vsub.f32 1.0, %v1724_v35 }
 0x9e5   :  { %v1441_v37 = vadd.f32 -1.0, %v654_v36  ;;  %v657_v41 = vmul.f32 %v656_v38, %v599_v25 }
 0x9e7   :  { %659 = vrot.lane.b32.xlu0 %v1441_v37, %s1880_s27 }
 0xa59   :  { %v660_v39 = vpop.permute.xlu0 %659 }
 0xa5a   :  { %v662_v42 = vmul.f32 %v1724_v35, %v660_v39 }
 0xa5c   :  { %v663_v47 = vadd.f32 %v662_v42, %v657_v41 }
 0xa5e   :  { %v664_v48 = vpack.c.bf16 %v663_v47, %v663_v47 }
 0xa60   :  { %1617 = vmatmul.mubr.msk.bf16.vlgmr.msra.gmra.mrb[16].mxu0 %vm136_vm1, %v664_v48 }
 0xa61   :  { %1650 = vmatprep.mubr.msk.f32.mxu0 %vm1888_vm0, %v1887_v0 }
 0xb33   :  { %v706_v45 = vpop.f32.mrb[16].mxu0 }
 0xb34   :  { %v707_v49 = vadd.f32 %v706_v45, %v2101_v46  ;;  %v1618_v50 = vpop.f32.mrb[17].mxu0  ;;  %v2205_v46 = vsub.s32 %v731_v63, %v2202_v1 }
 0xb35   :  { %v709_v51 = vpop.f32.mrb[18].mxu0 }
 0xb36   :  { %v1443_v52 = vmul.f32 -1.442695, %v707_v49  ;;  %v1619_v53 = vpop.f32.mrb[19].mxu0  ;;  %v760_v2 = vrot.slane %v2121_v15, %v2205_v46  ;;  %v735_v3 = vrot.slane %v2104_v57, %v2205_v46  ;;  %v783_v8 = vrot.slane %v2139_v32, %v2205_v46 }
 0xb37   :  { %v806_v9 = vrot.slane %v2157_v54, %v2205_v46  ;;  %v829_v14 = vrot.slane %v2174_v12, %v2205_v46  ;;  %v852_v57 = vrot.slane %v599_v25, %v2205_v46  ;;  %v875_v32 = vrot.slane %v663_v47, %v2205_v46 }
 0xb38   :  { %1725 = vpow2.f32 %v1443_v52  ;;  %v761_v6 = vcombine.high %v760_v2, %v760_v2  ;;  %v736_v10 = vcombine.high %v735_v3, %v735_v3  ;;  %v768_v13 = vrot.slane %v760_v2, %v2205_v46 }
 0xb39   :  { %v784_v16 = vcombine.high %v783_v8, %v783_v8  ;;  %v791_v4 = vrot.slane %v783_v8, %v2205_v46  ;;  %v743_v54 = vrot.slane %v735_v3, %v2205_v46  ;;  %v807_v17 = vcombine.high %v806_v9, %v806_v9 }
 0xb3a   :  { %v775_v15 = vrot.slane %v761_v6, %v2205_v46  ;;  %v750_v19 = vrot.slane %v736_v10, %v2205_v46  ;;  %v917_v20 = vrot.slane %v768_v13, %v2216_v43  ;;  %v814_v5 = vrot.slane %v806_v9, %v2205_v46 }
 0xb3b   :  { %v830_v12 = vcombine.high %v829_v14, %v829_v14  ;;  %v853_v22 = vcombine.high %v852_v57, %v852_v57  ;;  %v798_v7 = vrot.slane %v784_v16, %v2205_v46  ;;  %v927_v23 = vrot.slane %v791_v4, %v2216_v43 }
 0xb3c   :  { %v921_v21 = vrot.slane %v775_v15, %v2216_v43  ;;  %v837_v11 = vrot.slane %v829_v14, %v2205_v46  ;;  %v876_v24 = vcombine.high %v875_v32, %v875_v32  ;;  %v821_v44 = vrot.slane %v807_v17, %v2205_v46 }
 0xb3d   :  { %v860_v26 = vrot.slane %v852_v57, %v2205_v46  ;;  %v985_v29 = vsel %vm984_vm3, %v743_v54, %v917_v20  ;;  %v937_v30 = vrot.slane %v814_v5, %v2216_v43  ;;  %v844_v31 = vrot.slane %v830_v12, %v2205_v46 }
 0xb3e   :  { %v883_v33 = vrot.slane %v875_v32, %v2205_v46  ;;  %v867_v34 = vrot.slane %v853_v22, %v2205_v46  ;;  %v986_v36 = vsel %vm984_vm3, %v750_v19, %v921_v21  ;;  %v931_v37 = vrot.slane %v798_v7, %v2216_v43 }
 0xb3f   :  { %v947_v38 = vrot.slane %v837_v11, %v2216_v43  ;;  %v890_v39 = vrot.slane %v876_v24, %v2205_v46  ;;  %v988_v41 = vsel %vm987_vm4, %v985_v29, %v927_v23  ;;  %v941_v42 = vrot.slane %v821_v44, %v2216_v43 }
 0xb40   :  { %v951_v45 = vrot.slane %v844_v31, %v2216_v43  ;;  %v967_v49 = vrot.slane %v883_v33, %v2216_v43  ;;  %v991_v50 = vsel %vm990_vm5, %v988_v41, %v937_v30  ;;  %v961_v53 = vrot.slane %v867_v34, %v2216_v43 }
 0xb41   :  { %v1024_v16 = vand.u32 127, %v732_v62  ;;  %v1046_v5 = vsub.s32 1, %v2202_v1 }
 0xb42   :  { %v1726_v40 = vpop.eup %1725 }
 0xb43   :  { %v715_v55 = vadd.f32 1.0, %v1726_v40  ;;  %v994_v40 = vsel %vm993_vm6, %v991_v50, %v947_v38  ;;  %v2283_v4 = vsub.s32 %v1024_v16, %v2202_v1  ;;  %v1133_v38 = vld [vmem:[#allocation8] sm:$0xff] }
 0xb45   :  { %1727 = vrcp.f32 %v715_v55  ;;  %v971_v55 = vrot.slane %v890_v39, %v2216_v43  ;;  %v1134_v39 = vld [vmem:[#allocation8 + $0x8] sm:$0xff] }
 0xb46   :  { %v1654_v41 = vpack.c.bf16 %v1134_v39, %v1133_v38 }
 0xb4f   :  { %v1728_v56 = vpop.eup %1727 }
 0xb50   :  { %v718_v58 = vmul.f32 2.0, %v1728_v56  ;;  %v720_v18 = vsub.f32 1.0, %v1728_v56 }
 0xb52   :  { %v1444_v59 = vadd.f32 -1.0, %v718_v58  ;;  %v721_v27 = vmul.f32 %v720_v18, %v663_v47  ;;  %v957_v47 = vrot.slane %v860_v26, %v2216_v43 }
 0xb54   :  { %723 = vrot.lane.b32.xlu1 %v1444_v59, %s1880_s27  ;;  %v997_v60 = vsel %vm996_vm7, %v994_v40, %v957_v47 }
 0xb55   :  { %v1000_v2 = vsel %vm999_vm8, %v997_v60, %v967_v49 }
 0xbc6   :  { %v724_v25 = vpop.permute.xlu1 %723 }
 0xbc7   :  { %v726_v28 = vmul.f32 %v1728_v56, %v724_v25  ;;  %v989_v56 = vsel %vm987_vm4, %v986_v36, %v931_v37 }
 0xbc8   :  { %v992_v63 = vsel %vm990_vm5, %v989_v56, %v941_v42  ;;  %v1891_v42 = vmov 0.0|0.0  }
 0xbc9   :  { %v2240_v35 = vadd.f32 %v726_v28, %v721_v27  ;;  %v995_v3 = vsel %vm993_vm6, %v992_v63, %v951_v45  ;;  %1653 = vmatprep.subr.bf16.mxu1 %v1891_v42  ;;  %1665 = vmatprep.subr.bf16.mxu0 %v1891_v42  ;;  %v1136_v45 = vld [vmem:[#allocation8 + $0x18] sm:$0xff] }
 0xbca   :  { %v998_v8 = vsel %vm996_vm7, %v995_v3, %v961_v53  ;;  %1655 = vmatpush3.bf16.msra.mxu1 %v1654_v41  ;;  %v1130_v53 = vld [vmem:[#allocation7 + $0x8] sm:$0xff] }
 0xbcb   :  { %v898_v48 = vrot.slane %v2240_v35, %v2205_v46  ;;  %v1001_v10 = vsel %vm999_vm8, %v998_v8, %v971_v55  ;;  %1656 = vmatprep.subr.bf16.mxu1 %v1891_v42 }
 0xbcd   :  { %v899_v51 = vcombine.high %v898_v48, %v898_v48  ;;  %v906_v52 = vrot.slane %v898_v48, %v2205_v46  ;;  %v1135_v48 = vld [vmem:[#allocation8 + $0x10] sm:$0xff] }
 0xbcf   :  { %v913_v58 = vrot.slane %v899_v51, %v2205_v46  ;;  %v977_v59 = vrot.slane %v906_v52, %v2216_v43  ;;  %v1129_v52 = vld [vmem:[#allocation7] sm:$0xff] }
 0xbd1   :  { %v2269_v6 = vsel %vm1002_vm9, %v1000_v2, %v977_v59  ;;  %v981_v46 = vrot.slane %v913_v58, %v2216_v43  ;;  %v1132_v2 = vld [vmem:[#allocation7 + $0x18] sm:$0xff] }
 0xbd2   :  { %v1012_v9 = vmul.f32 %v1445_v61, %v2269_v6 }
 0xbd3   :  { %v2276_v13 = vsel %vm1002_vm9, %v1001_v10, %v981_v46 }
 0xbd4   :  { %v1015_v14 = vsel %vm1014_vm10, %v1012_v9, 0.0  ;;  %v1013_v15 = vmul.f32 %v1445_v61, %v2276_v13  ;;  %v1660_v61 = vpack.c.bf16 %v1130_v53, %v1129_v52 }
 0xbd5   :  { %1016 = vadd.xlane.f32.xlu0 %v1015_v14 }
 0xbd6   :  { %v1018_v57 = vsel %vm1014_vm10, %v1013_v15, 0.0 }
 0xbd7   :  { %1019 = vadd.xlane.f32.xlu1 %v1018_v57 }
 0xc62   :  { %v1017_v32 = vpop.xlane.xlu0 %1016 }
 0xc63   :  { %v1028_v17 = vrot.slane %v1017_v32, %v2283_v4 }
 0xc64   :  { %v1020_v54 = vpop.xlane.xlu1 %1019 }
 0xc65   :  { %v1032_v18 = vrot.slane %v1020_v54, %v2283_v4 }
 0xc67   :  { %v1033_v19 = vsel %vm219_vm2, %v1032_v18, %v1028_v17  ;;  %v1295_v17 = vld [vmem:[%s2361_s8] sm:$0xff] }
 0xc68   :  { %v1036_v20 = vsel %vm1035_vm11, %v1033_v19, -inf  ;;  %v1297_v19 = vld [vmem:[%s2361_s8 + $0x10] sm:$0xff] }
 0xc69   :  { %1037 = vmax.xlane.f32.xlu0 %v1036_v20  ;;  %v1298_v20 = vld [vmem:[%s2361_s8 + $0x18] sm:$0xff] }
 0xcf6   :  { %v1038_v12 = vpop.xlane.xlu0 %1037 }
 0xcf7   :  { %v1043_v62 = vrot.slane %v1038_v12, %v2216_v43  ;;  %v1047_v21 = vrot.slane %v1038_v12, %v1046_v5 }
 0xcf9   :  { %v1050_v22 = vsub.f32 %v1017_v32, %v1043_v62  ;;  %v1051_v7 = vsub.f32 %v1020_v54, %v1047_v21 }
 0xcfb   :  { %v1052_v23 = vmul.f32 1.442695, %v1050_v22  ;;  %v1054_v11 = vmul.f32 1.442695, %v1051_v7  ;;  %v1448_v22 = vld [vmem:[%s2360_s7] ss:$0 sm:$0xff] }
 0xcfd   :  { %1729 = vpow2.f32 %v1052_v23 }
 0xcfe   :  { %1731 = vpow2.f32 %v1054_v11 }
 0xd07   :  { %v1730_v24 = vpop.eup %1729 }
 0xd08   :  { %v1732_v25 = vpop.eup %1731  ;;  %1059 = vperm.xlu0 %1687, %v1730_v24  }
 0xd09   :  { %1062 = vperm.xlu1 %1688, %v1732_v25  }
 0xd87   :  { %v1060_v44 = vpop.permute.xlu0 %1059 }
 0xd88   :  { %v1063_v26 = vpop.permute.xlu1 %1062  ;;  %v1067_v27 = vrot.slane %v1060_v44, %v2283_v4 }
 0xd89   :  { %v1071_v1 = vrot.slane %v1063_v26, %v2283_v4 }
 0xd8b   :  { %v1072_v28 = vsel %vm219_vm2, %v1071_v1, %v1067_v27 }
 0xd8c   :  { %v1074_v29 = vsel %vm1035_vm11, %v1072_v28, 0.0 }
 0xd8d   :  { %1075 = vadd.xlane.f32.xlu1 %v1074_v29 }
 0xe1a   :  { %v1076_v30 = vpop.xlane.xlu1 %1075 }
 0xe1b   :  { %v1081_v31 = vrot.slane %v1076_v30, %v2216_v43  ;;  %v1085_v33 = vrot.slane %v1076_v30, %v1046_v5  ;;  %v1657_v43 = vpack.c.bf16 %v1136_v45, %v1135_v48  ;;  %v1669_v5 = vpack.c.bf16 %v1298_v20, %v1297_v19 }
 0xe1d   :  { %1733 = vrcp.f32 %v1081_v31  ;;  %1658 = vmatpush3.bf16.msra.mxu1 %v1657_v43 }
 0xe1e   :  { %1735 = vrcp.f32 %v1085_v33  ;;  %1659 = vmatprep.subr.bf16.mxu1 %v1891_v42 }
 0xe27   :  { %v1734_v34 = vpop.eup %1733 }
 0xe28   :  { %v1089_v36 = vmul.f32 %v1734_v34, %v1730_v24  ;;  %v1736_v37 = vpop.eup %1735 }
 0xe29   :  { %v1091_v47 = vmul.f32 %v1736_v37, %v1732_v25 }
 0xe2a   :  { %1095 = vperm.xlu0 %1687, %v1089_v36  }
 0xe2e   :  { %1098 = vperm.xlu0 %1687, %v1091_v47  }
 0xe32   :  { %1137 = vrot.lane.b32.xlu0 %v2240_v35, %s1892_s4  ;;  %v1131_v35 = vld [vmem:[#allocation7 + $0x10] sm:$0xff] }
 0xe33   :  { %v1663_v14 = vpack.c.bf16 %v1132_v2, %v1131_v35 }
 0xea9   :  { %v1096_v49 = vpop.permute.xlu0 %1095 }
 0xeaa   :  { %v1113_v50 = vmul.f32 %v1096_v49, %v2269_v6  ;;  %v1103_v56 = vrot.slane %v1096_v49, %v2283_v4 }
 0xeac   :  { %v1115_v51 = vsel %vm1014_vm10, %v1113_v50, 0.0 }
 0xead   :  { %v1116_v40 = vrot.slane %v1115_v51, 4  ;;  %v1099_v55 = vpop.permute.xlu0 %1098 }
 0xeae   :  { %v1107_v58 = vrot.slane %v1099_v55, %v2283_v4  ;;  %v1114_v59 = vmul.f32 %v1099_v55, %v2276_v13 }
 0xeaf   :  { %v1117_v60 = vadd.f32 %v1116_v40, %v1115_v51 }
 0xeb0   :  { %v1122_v63 = vsel %vm1014_vm10, %v1114_v59, 0.0  ;;  %v1108_v3 = vsel %vm219_vm2, %v1107_v58, %v1103_v56 }
 0xeb1   :  { %v1118_v6 = vrot.slane %v1117_v60, 2  ;;  %v1123_v46 = vrot.slane %v1122_v63, 4  ;;  %v1138_v8 = vpop.permute.xlu0 %1137  ;;  %1110 = vst.msk [vmem:[#allocation11] sm:$0x3] %vm1035_vm11, %v1108_v3 }
 0xeb2   :  { %1629 = vmatmul.mubr.msk.f32.vlgmr.msra.gmra.mrb[16].mxu1 %vm1014_vm10, %v1138_v8 }
 0xeb3   :  { %v1119_v9 = vadd.f32 %v1118_v6, %v1117_v60  ;;  %v1124_v10 = vadd.f32 %v1123_v46, %v1122_v63  ;;  %1661 = vmatpush3.bf16.msra.mxu1 %v1660_v61  ;;  %1639 = vmatprep.mubr.msk.f32.mxu1 %vm1888_vm0, %v1887_v0  ;;  %v1296_v0 = vld [vmem:[%s2361_s8 + $0x8] sm:$0xff] }
 0xeb4   :  { %1662 = vmatprep.subr.bf16.mxu1 %v1891_v42  ;;  %v1666_v18 = vpack.c.bf16 %v1296_v0, %v1295_v17 }
 0xeb5   :  { %v1125_v13 = vrot.slane %v1124_v10, 2  ;;  %v1120_v15 = vrot.slane %v1119_v9, 1 }
 0xeb6   :  { %1667 = vmatpush3.bf16.msra.mxu0 %v1666_v18 }
 0xeb7   :  { %v1126_v57 = vadd.f32 %v1125_v13, %v1124_v10  ;;  %1664 = vmatpush3.bf16.msra.mxu1 %v1663_v14  ;;  %v1121_v4 = vadd.f32 %v1120_v15, %v1119_v9  ;;  %1668 = vmatprep.subr.bf16.mxu0 %v1891_v42 }
 0xeb9   :  { %v1127_v16 = vrot.slane %v1126_v57, 1 }
 0xeba   :  { %1670 = vmatpush3.bf16.msra.mxu0 %v1669_v5 }
 0xebb   :  { %v1128_v32 = vadd.f32 %v1127_v16, %v1126_v57 }
 0xebd   :  { %v1213_v54 = vsel %vm219_vm2, %v1128_v32, %v1121_v4 }
 0xebe   :  { %1640 = vmatmul.mubr.msk.f32.vlgmr.msra.gmra.mrb[18].mxu1 %vm1014_vm10, %v1213_v54 }
 0xf85   :  { %v1207_v12 = vpop.f32.mrb[16].mxu1 }
 0xf86   :  { %v1630_v62 = vpop.f32.mrb[17].mxu1 }
 0xf91   :  { %v1282_v21 = vpop.f32.mrb[18].mxu1 }
 0xf92   :  { %v1283_v7 = vadd.f32 %v1282_v21, %v1207_v12  ;;  %v1641_v23 = vpop.f32.mrb[19].mxu1 }
 0xf94   :  { %v1293_v11 = vadd.f32 %v1448_v22, %v1283_v7 }
 0xf96   :  { %v1294_v24 = vmax.f32 %v1293_v11, 0.0 }
 0xf98   :  { %1651 = vmatmul.mubr.msk.f32.vlgmr.msra.gmra.mrb[20].mxu0 %vm1014_vm10, %v1294_v24 }
 0xf99   :  { %1836 = shalt.err (!%p1833_p8)
}
 0xf9a   :  { %s1837_s7 = scalar_lea.hbm %s2364_s11, 32 }
 0xf9b   :  { %p1838_p9 = scmp.ne.s32.totalorder %s2364_s11, %s1837_s7  ;;  %p1841_p10 = scmp.lt.u32.totalorder %s1837_s7, %s2364_s11 }
 0xf9d   :  { %p1843_p11 = pnand %p1841_p10, %p1838_p9 }
 0xf9f   :  { %1846 = shalt.err (!%p1843_p11)
}
 0xfa0   :  { %1400 = dma.vmem_to_hbm [thread:$0]  %s1398_s5, 32, %s2364_s11, [#allocation12]   ;;  %v1449_v25 = vld [vmem:[%s2362_s9] ss:$0 sm:$0xff]  ;;  %vm1379_vm12 = vcmask 17408  }
 0xfa1   :  { %s1894_s19 = smov [#allocation10]  }
 0xfa2   :  { %s1387_s2 = sshll.u32 %s1894_s19, 4  ;;  %s1388_s2 = int_to_ptr.vmem [resolvable:$true] %s1387_s2 }
 0xfa3   :  { %s1847_s27 = scalar_lea.vmem %s1388_s2, 32  ;;  %p1852_p13 = scmp.lt.s32.totalorder %s1388_s2, %s1388_s2 }
 0xfa4   :  { %p1848_p12 = scmp.ne.s32.totalorder %s1388_s2, %s1847_s27  ;;  %p1853_p0 = scmp.lt.s32.totalorder %s1847_s27, %s1847_s27 }
 0xfa6   :  { %p1854_p1 = por %p1853_p0, %p1852_p13 }
 0xfa8   :  { %p1855_p2 = pnand %p1854_p1, %p1848_p12 }
0x106b   :  { %v1375_v44 = vpop.f32.mrb[20].mxu0 }
0x106c   :  { %v1376_v26 = vadd.f32 %v1449_v25, %v1375_v44  ;;  %v1652_v27 = vpop.f32.mrb[21].mxu0 }
0x106e   :  { %1380 = vst.msk [vmem:[#allocation10] sm:$0x3] %vm1379_vm12, %v1376_v26 }
0x106f   :  { %1858 = shalt.err (!%p1855_p2)
}
0x1070   :  { %s1859_s0 = scalar_lea.hbm %s2363_s10, 32 }
0x1071   :  { %p1860_p3 = scmp.ne.s32.totalorder %s2363_s10, %s1859_s0  ;;  %p1863_p4 = scmp.lt.u32.totalorder %s1859_s0, %s2363_s10 }
0x1073   :  { %p1865_p5 = pnand %p1863_p4, %p1860_p3 }
0x1075   :  { %1868 = shalt.err (!%p1865_p5)
}
0x1076   :  { %1390 = dma.vmem_to_hbm [thread:$0]  %s1388_s2, 32, %s2363_s10, [#allocation4]  }
0x1077   :  { %1875 = dma.done.wait [#allocation4], 32  }
0x1078   :  { %1876 = vsyncadd [#allocation4], 4294967264 }
0x1079   :  { %1877 = dma.done.wait [#allocation12], 32  }
0x107a   :  { %1878 = vsyncadd [#allocation12], 4294967264 }
0x107b   :  { %1407 = vsyncpa [#allocation3], 1 }
0x107c   :  { %1408 = vsyncpa [#allocation6], 1 }
0x107d   :  { %1409 = vsyncpa [#allocation9], 1 }
0x107e   :  { %1410 = vsyncpa [#allocation4], 1 }
0x107f   :  { %1411 = vsyncpa [#allocation12], 1 }

</bundles_post_ra>
